<compile_context>
chip_gen: v6e
topology: v6e:2x2x1
jax: 0.10.0
libtpu: 0.0.40
codegen_flags: <defaults>
</compile_context>

<pallas_src>
import functools

import jax
import jax.numpy as jnp
from jax.experimental import pallas as pl
from jax.experimental.pallas import tpu as pltpu


# --------------------------------------------------------------------------
# Kernels
# --------------------------------------------------------------------------
def _layernorm(xv, ln_g, ln_b, dim_real, dim_is_padded):
    """LayerNorm over the last dim of xv (rows, dim_pad); padded lanes masked."""
    inv_dim = 1.0 / dim_real
    mean = jnp.sum(xv, axis=-1, keepdims=True) * inv_dim
    cen = xv - mean
    if dim_is_padded:
        lane = jax.lax.broadcasted_iota(jnp.int32, xv.shape, 1)
        cen_sq = jnp.where(lane < dim_real, cen, 0.0)
    else:
        cen_sq = cen
    var = jnp.sum(cen_sq * cen_sq, axis=-1, keepdims=True) * inv_dim
    # padded lanes of ln_g / ln_b are zero -> padded lanes of the result are 0
    return cen * jax.lax.rsqrt(var + 1e-5) * ln_g + ln_b


def gau_proj_kernel(x_ref, ln_g_ref, ln_b_ref, w_ref, b_ref, gamma_ref, beta_ref,
                    q_ref, k_ref, v_ref, gate_ref,
                    *, dim_real, seq_real, seq_tile, qk_dim, hidden_dim,
                    dim_is_padded, seq_is_padded):
    """LayerNorm + fused [z|v|gate] projection + SiLU + per-head affine."""
    xv = x_ref[0].astype(jnp.float32)                       # (tt, dim_pad)
    normed = _layernorm(xv, ln_g_ref[...], ln_b_ref[...], dim_real, dim_is_padded)

    p = jnp.dot(normed.astype(jnp.bfloat16), w_ref[...],
                preferred_element_type=jnp.float32) + b_ref[...]
    p = p * jax.nn.sigmoid(p)                               # SiLU, f32

    z = p[:, :qk_dim]
    v = p[:, qk_dim:qk_dim + hidden_dim]
    gate = p[:, qk_dim + hidden_dim:]

    # per-head affine; 1/seq_len folded into q (removes the (N,N) divide)
    q = (z * gamma_ref[0:1, :] + beta_ref[0:1, :]) * (1.0 / seq_real)
    k = z * gamma_ref[1:2, :] + beta_ref[1:2, :]

    if seq_is_padded:
        # zero padded key rows / values so the attention pass needs no masking
        row = (pl.program_id(1) * seq_tile
               + jax.lax.broadcasted_iota(jnp.int32, (seq_tile, 1), 0))
        valid = row < seq_real
        k = jnp.where(valid, k, 0.0)
        v = jnp.where(valid, v, 0.0)

    q_ref[0] = q.astype(q_ref.dtype)
    k_ref[0] = k.astype(k_ref.dtype)
    v_ref[0] = v.astype(v_ref.dtype)
    gate_ref[0] = gate.astype(gate_ref.dtype)


def gau_attn_kernel(xq_ref, q_ref, gate_ref, k_ref, v_ref, wo_ref, bo_ref,
                    out_ref, acc_ref):
    """Blocked relu^2 attention + gate + output projection + residual."""
    ki = pl.program_id(2)

    @pl.when(ki == 0)
    def _():
        acc_ref[...] = jnp.zeros(acc_ref.shape, acc_ref.dtype)

    # sim = (q / N) . k^T -- NT contraction, no transpose materialized.
    sim = jax.lax.dot_general(
        q_ref[0], k_ref[0],
        dimension_numbers=(((1,), (1,)), ((), ())),
        preferred_element_type=jnp.float32)                 # (tq, tk) f32
    a = jnp.maximum(sim, 0.0)
    a = a * a                                               # relu^2 (dropout p=0)
    acc_ref[...] += jnp.dot(a.astype(jnp.bfloat16), v_ref[0],
                            preferred_element_type=jnp.float32)

    @pl.when(ki == pl.num_programs(2) - 1)
    def _():
        vmix = acc_ref[...] * gate_ref[0].astype(jnp.float32)   # (tq, hidden)
        out = jnp.dot(vmix.astype(jnp.bfloat16), wo_ref[...],
                      preferred_element_type=jnp.float32) + bo_ref[...]
        out_ref[0] = (out + xq_ref[0]).astype(out_ref.dtype)     # residual


# --------------------------------------------------------------------------
# Wrapper
# --------------------------------------------------------------------------
def _seq_tiling(n, target):
    """Uniform sequence tile (multiple of 16) and padded sequence length."""
    target = max(16, (target // 16) * 16)
    if n >= target:
        t = target
    else:
        t = max(16, ((n + 15) // 16) * 16)
    n_pad = ((n + t - 1) // t) * t
    return t, n_pad


def _vmem_limit_bytes():
    """Generation-aware VMEM budget with headroom (56 MiB on v7x, 100 on v5e/v6e)."""
    cap = 64 * 1024 * 1024
    try:
        info = pltpu.get_tpu_info()
        cap = int(getattr(info, "vmem_capacity_bytes", cap))
    except Exception:
        pass
    return int(min(cap - 8 * 1024 * 1024, 100 * 1024 * 1024))


def _const_spec(shape, single_buffer):
    """BlockSpec for weights that stay resident across the whole grid."""
    ndim = len(shape)
    index_map = lambda *_: (0,) * ndim
    if single_buffer:
        # never re-fetched -> single buffer halves their VMEM footprint
        return pl.BlockSpec(shape, index_map, pipeline_mode=pl.Buffered(1))
    return pl.BlockSpec(shape, index_map)


def gau_forward(x, params, *, seq_tile_target=256, single_buffer_weights=True):
    """x: (B, N, dim) float32. params: dict of weights (see init_gau_params)."""
    B, N, dim = x.shape
    hidden = params["w_out"].shape[0]          # hidden_dim
    qk = params["w_qk"].shape[1]               # query_key_dim

    # ---- padded geometry: lane-dense feature dim, uniform sequence tiles ----
    dim_pad = ((dim + 127) // 128) * 128
    tseq, n_pad = _seq_tiling(N, seq_tile_target)
    dpad = dim_pad - dim
    proj_w = qk + 2 * hidden

    x_p = x
    if n_pad != N or dpad != 0:
        x_p = jnp.pad(x, ((0, 0), (0, n_pad - N), (0, dpad)))

    ln_g = jnp.pad(params["ln_gamma"], ((0, 0), (0, dpad)))
    ln_b = jnp.pad(params["ln_beta"], ((0, 0), (0, dpad)))

    # fused projection:  [ w_qk | w_v | w_gate ]  (z first -> lane aligned)
    w_v, w_gate = jnp.split(params["w_hidden"], 2, axis=1)
    b_v, b_gate = jnp.split(params["b_hidden"], 2, axis=1)
    w_all = jnp.concatenate([params["w_qk"], w_v, w_gate], axis=1)
    b_all = jnp.concatenate([params["b_qk"], b_v, b_gate], axis=1)
    w_all = jnp.pad(w_all, ((0, dpad), (0, 0))).astype(jnp.bfloat16)
    w_out = jnp.pad(params["w_out"], ((0, 0), (0, dpad))).astype(jnp.bfloat16)
    b_out = jnp.pad(params["b_out"], ((0, 0), (0, dpad)))

    vmem_limit = _vmem_limit_bytes()
    n_tiles = n_pad // tseq

    proj_kernel = functools.partial(
        gau_proj_kernel, dim_real=dim, seq_real=N, seq_tile=tseq,
        qk_dim=qk, hidden_dim=hidden,
        dim_is_padded=(dpad != 0), seq_is_padded=(n_pad != N))

    def run(single_buffer):
        const = lambda shape: _const_spec(shape, single_buffer)

        # ---------------- pass 1: projection -------------------------------
        q, k, v, gate = pl.pallas_call(
            proj_kernel,
            out_shape=(
                jax.ShapeDtypeStruct((B, n_pad, qk), jnp.bfloat16),      # q
                jax.ShapeDtypeStruct((B, n_pad, qk), jnp.bfloat16),      # k
                jax.ShapeDtypeStruct((B, n_pad, hidden), jnp.bfloat16),  # v
                jax.ShapeDtypeStruct((B, n_pad, hidden), jnp.bfloat16),  # gate
            ),
            grid_spec=pltpu.PrefetchScalarGridSpec(
                num_scalar_prefetch=0,
                grid=(B, n_tiles),
                in_specs=[
                    pl.BlockSpec((1, tseq, dim_pad), lambda b, t: (b, t, 0)),
                    const((1, dim_pad)),           # LN gamma
                    const((1, dim_pad)),           # LN beta
                    const((dim_pad, proj_w)),      # fused W  [z | v | gate]
                    const((1, proj_w)),            # fused bias
                    const((2, qk)),                # per-head gamma
                    const((2, qk)),                # per-head beta
                ],
                out_specs=(
                    pl.BlockSpec((1, tseq, qk), lambda b, t: (b, t, 0)),
                    pl.BlockSpec((1, tseq, qk), lambda b, t: (b, t, 0)),
                    pl.BlockSpec((1, tseq, hidden), lambda b, t: (b, t, 0)),
                    pl.BlockSpec((1, tseq, hidden), lambda b, t: (b, t, 0)),
                ),
            ),
            compiler_params=pltpu.CompilerParams(
                dimension_semantics=("parallel", "parallel"),
                vmem_limit_bytes=vmem_limit),
        )(x_p, ln_g, ln_b, w_all, b_all, params["gamma"], params["beta"])

        # ---------------- pass 2: blocked attention ------------------------
        out = pl.pallas_call(
            gau_attn_kernel,
            out_shape=jax.ShapeDtypeStruct((B, n_pad, dim_pad), x.dtype),
            grid_spec=pltpu.PrefetchScalarGridSpec(
                num_scalar_prefetch=0,
                grid=(B, n_tiles, n_tiles),
                in_specs=[
                    pl.BlockSpec((1, tseq, dim_pad), lambda b, qi, ki: (b, qi, 0)),  # x (residual)
                    pl.BlockSpec((1, tseq, qk), lambda b, qi, ki: (b, qi, 0)),       # q
                    pl.BlockSpec((1, tseq, hidden), lambda b, qi, ki: (b, qi, 0)),   # gate
                    pl.BlockSpec((1, tseq, qk), lambda b, qi, ki: (b, ki, 0)),       # k
                    pl.BlockSpec((1, tseq, hidden), lambda b, qi, ki: (b, ki, 0)),   # v
                    const((hidden, dim_pad)),                                        # W out
                    const((1, dim_pad)),                                             # b out
                ],
                out_specs=pl.BlockSpec((1, tseq, dim_pad), lambda b, qi, ki: (b, qi, 0)),
                scratch_shapes=[pltpu.VMEM((tseq, hidden), jnp.float32)],
            ),
            compiler_params=pltpu.CompilerParams(
                dimension_semantics=("parallel", "parallel", "arbitrary"),
                vmem_limit_bytes=vmem_limit),
        )(x_p, q, gate, k, v, w_out, b_out)
        return out

    if single_buffer_weights:
        try:
            out = run(True)
        except Exception:          # pl.Buffered(1) unsupported -> default buffering
            out = run(False)
    else:
        out = run(False)

    return out[:, :N, :dim]


# --------------------------------------------------------------------------
# Synthetic params + pure-JAX reference
# --------------------------------------------------------------------------
def init_gau_params(key, dim, query_key_dim, expansion_factor=2.0):
    """Deterministic synthetic parameters matching the module's shapes."""
    hidden_dim = int(expansion_factor * dim)
    ks = jax.random.split(key, 10)
    f32 = jnp.float32
    return {
        # nn.LayerNorm(dim)
        "ln_gamma": 1.0 + 0.1 * jax.random.normal(ks[0], (1, dim), f32),
        "ln_beta": 0.1 * jax.random.normal(ks[1], (1, dim), f32),
        # to_hidden: Linear(dim, 2*hidden_dim)
        "w_hidden": 0.05 * jax.random.normal(ks[2], (dim, 2 * hidden_dim), f32),
        "b_hidden": 0.05 * jax.random.normal(ks[3], (1, 2 * hidden_dim), f32),
        # to_qk: Linear(dim, query_key_dim)
        "w_qk": 0.05 * jax.random.normal(ks[4], (dim, query_key_dim), f32),
        "b_qk": 0.05 * jax.random.normal(ks[5], (1, query_key_dim), f32),
        # gamma / beta (shape (2, query_key_dim)); magnitudes chosen so the
        # attention path contributes measurably to the correctness check.
        "gamma": 1.0 + 0.02 * jax.random.normal(ks[6], (2, query_key_dim), f32),
        "beta": 0.02 * jax.random.normal(ks[7], (2, query_key_dim), f32),
        # to_out: Linear(hidden_dim, dim)
        "w_out": 0.05 * jax.random.normal(ks[8], (hidden_dim, dim), f32),
        "b_out": 0.05 * jax.random.normal(ks[9], (1, dim), f32),
    }


def gau_reference(x, params):
    """Pure-JAX f32 reference mirroring the PyTorch forward."""
    seq_len = x.shape[-2]
    mean = jnp.mean(x, axis=-1, keepdims=True)
    var = jnp.mean((x - mean) ** 2, axis=-1, keepdims=True)
    normed = (x - mean) / jnp.sqrt(var + 1e-5)
    normed = normed * params["ln_gamma"][0] + params["ln_beta"][0]
    hid = normed @ params["w_hidden"] + params["b_hidden"][0]
    hid = hid * jax.nn.sigmoid(hid)
    v, gate = jnp.split(hid, 2, axis=-1)
    z = normed @ params["w_qk"] + params["b_qk"][0]
    z = z * jax.nn.sigmoid(z)
    qk = z[..., None, :] * params["gamma"] + params["beta"]     # (B,N,2,qk)
    q, k = qk[..., 0, :], qk[..., 1, :]
    sim = jnp.einsum("bid,bjd->bij", q, k) / seq_len
    a = jnp.maximum(sim, 0.0) ** 2
    vmix = jnp.einsum("bij,bjd->bid", a, v) * gate
    out = vmix @ params["w_out"] + params["b_out"][0]
    return out + x


# --------------------------------------------------------------------------
# Self-test
# --------------------------------------------------------------------------
if __name__ == "__main__":
    key = jax.random.PRNGKey(0)

    # Case 1: module-consistent small shapes (batch=2, seq=8, dim=32,
    # expansion_factor=2 -> hidden=64, query_key_dim=128 default).
    # seq is padded to the 16-row tile -> exercises key-row masking.
    k1, k2, k3, k4 = jax.random.split(key, 4)
    B, N, DIM, QK = 2, 8, 32, 128
    x = jax.random.normal(k1, (B, N, DIM), jnp.float32)
    params = init_gau_params(k2, DIM, QK, expansion_factor=2.0)
    out = jax.block_until_ready(gau_forward(x, params))
    ref = gau_reference(x, params)
    assert out.shape == (B, N, DIM)
    err = float(jnp.max(jnp.abs(out - ref)))
    assert err < 5e-3, f"case1 mismatch vs reference: max abs err = {err}"

    # Case 2: multi-tile grid (3 q-tiles x 3 k-tiles) with sequence padding,
    # exercising the flash-style accumulation across key tiles.
    B2, N2, DIM2 = 1, 40, 48
    x2 = jax.random.normal(k3, (B2, N2, DIM2), jnp.float32)
    params2 = init_gau_params(k4, DIM2, QK, expansion_factor=2.0)
    out2 = jax.block_until_ready(gau_forward(x2, params2, seq_tile_target=16))
    ref2 = gau_reference(x2, params2)
    assert out2.shape == (B2, N2, DIM2)
    err2 = float(jnp.max(jnp.abs(out2 - ref2)))
    assert err2 < 5e-3, f"case2 mismatch vs reference: max abs err = {err2}"

    print("KERNEL_OK")
</pallas_src>

<mosaic_0001>
module attributes {stable_mosaic.version = 11 : i64} {
  func.func @gau_proj_kernel(%arg0: i32, %arg1: i32, %arg2: memref<1x16x128xf32, #tpu.memory_space<vmem>>, %arg3: memref<1x128xf32, #tpu.memory_space<vmem>>, %arg4: memref<1x128xf32, #tpu.memory_space<vmem>>, %arg5: memref<128x256xbf16, #tpu.memory_space<vmem>>, %arg6: memref<1x256xf32, #tpu.memory_space<vmem>>, %arg7: memref<2x128xf32, #tpu.memory_space<vmem>>, %arg8: memref<2x128xf32, #tpu.memory_space<vmem>>, %arg9: memref<1x16x128xbf16, #tpu.memory_space<vmem>>, %arg10: memref<1x16x128xbf16, #tpu.memory_space<vmem>>, %arg11: memref<1x16x64xbf16, #tpu.memory_space<vmem>>, %arg12: memref<1x16x64xbf16, #tpu.memory_space<vmem>>) attributes {dimension_semantics = [#tpu.dimension_semantics<parallel>, #tpu.dimension_semantics<parallel>], iteration_bounds = array<i64: 2, 1>, scalar_prefetch = 0 : i64, scratch_operands = 0 : i64, tpu.core_type = #tpu.core_type<tc>, window_params = [{transform_indices = @transform_0, window_bounds = array<i64: 1, 16, 128>}, {pipeline_mode = #tpu.pipeline_mode<synchronous>, transform_indices = @transform_1, window_bounds = array<i64: 1, 128>}, {pipeline_mode = #tpu.pipeline_mode<synchronous>, transform_indices = @transform_2, window_bounds = array<i64: 1, 128>}, {pipeline_mode = #tpu.pipeline_mode<synchronous>, transform_indices = @transform_3, window_bounds = array<i64: 128, 256>}, {pipeline_mode = #tpu.pipeline_mode<synchronous>, transform_indices = @transform_4, window_bounds = array<i64: 1, 256>}, {pipeline_mode = #tpu.pipeline_mode<synchronous>, transform_indices = @transform_5, window_bounds = array<i64: 2, 128>}, {pipeline_mode = #tpu.pipeline_mode<synchronous>, transform_indices = @transform_6, window_bounds = array<i64: 2, 128>}, {transform_indices = @transform_7, window_bounds = array<i64: 1, 16, 128>}, {transform_indices = @transform_8, window_bounds = array<i64: 1, 16, 128>}, {transform_indices = @transform_9, window_bounds = array<i64: 1, 16, 64>}, {transform_indices = @transform_10, window_bounds = array<i64: 1, 16, 64>}]} {
    %c0 = arith.constant 0 : index
    %c0_0 = arith.constant 0 : index
    %c0_1 = arith.constant 0 : index
    %0 = vector.load %arg2[%c0, %c0_0, %c0_1] : memref<1x16x128xf32, #tpu.memory_space<vmem>>, vector<1x16x128xf32>
    %1 = vector.shape_cast %0 : vector<1x16x128xf32> to vector<16x128xf32>
    %c0_2 = arith.constant 0 : index
    %c0_3 = arith.constant 0 : index
    %2 = vector.load %arg3[%c0_2, %c0_3] : memref<1x128xf32, #tpu.memory_space<vmem>>, vector<1x128xf32>
    %c0_4 = arith.constant 0 : index
    %c0_5 = arith.constant 0 : index
    %3 = vector.load %arg4[%c0_4, %c0_5] : memref<1x128xf32, #tpu.memory_space<vmem>>, vector<1x128xf32>
    %cst = arith.constant dense<0.000000e+00> : vector<16xf32>
    %4 = vector.multi_reduction <add>, %1, %cst [1] : vector<16x128xf32> to vector<16xf32>
    %5 = vector.shape_cast %4 : vector<16xf32> to vector<16x1xf32>
    %cst_6 = arith.constant 3.125000e-02 : f32
    %6 = vector.broadcast %cst_6 : f32 to vector<16x1xf32>
    %7 = arith.mulf %5, %6 : vector<16x1xf32>
    %8 = vector.broadcast %7 : vector<16x1xf32> to vector<16x128xf32>
    %9 = arith.subf %1, %8 : vector<16x128xf32>
    %10 = tpu.iota {dimensions = array<i32: 1>} : vector<16x128xi32>
    %c32_i32 = arith.constant 32 : i32
    %11 = vector.broadcast %c32_i32 : i32 to vector<16x128xi32>
    %12 = arith.cmpi slt, %10, %11 : vector<16x128xi32>
    %cst_7 = arith.constant 0.000000e+00 : f32
    %13 = vector.broadcast %cst_7 : f32 to vector<16x128xf32>
    %14 = arith.select %12, %9, %13 : vector<16x128xi1>, vector<16x128xf32>
    %15 = arith.mulf %14, %14 : vector<16x128xf32>
    %cst_8 = arith.constant dense<0.000000e+00> : vector<16xf32>
    %16 = vector.multi_reduction <add>, %15, %cst_8 [1] : vector<16x128xf32> to vector<16xf32>
    %17 = vector.shape_cast %16 : vector<16xf32> to vector<16x1xf32>
    %cst_9 = arith.constant 3.125000e-02 : f32
    %18 = vector.broadcast %cst_9 : f32 to vector<16x1xf32>
    %19 = arith.mulf %17, %18 : vector<16x1xf32>
    %cst_10 = arith.constant 9.99999974E-6 : f32
    %20 = vector.broadcast %cst_10 : f32 to vector<16x1xf32>
    %21 = arith.addf %19, %20 : vector<16x1xf32>
    %22 = math.rsqrt %21 : vector<16x1xf32>
    %23 = vector.broadcast %22 : vector<16x1xf32> to vector<16x128xf32>
    %24 = arith.mulf %9, %23 : vector<16x128xf32>
    %25 = vector.broadcast %2 : vector<1x128xf32> to vector<16x128xf32>
    %26 = arith.mulf %24, %25 : vector<16x128xf32>
    %27 = vector.broadcast %3 : vector<1x128xf32> to vector<16x128xf32>
    %28 = arith.addf %26, %27 : vector<16x128xf32>
    %29 = arith.truncf %28 : vector<16x128xf32> to vector<16x128xbf16>
    %c0_11 = arith.constant 0 : index
    %c0_12 = arith.constant 0 : index
    %30 = vector.load %arg5[%c0_11, %c0_12] : memref<128x256xbf16, #tpu.memory_space<vmem>>, vector<128x256xbf16>
    %cst_13 = arith.constant dense<0.000000e+00> : vector<16x256xf32>
    %31 = tpu.matmul %29, %30, %cst_13 {dimension_numbers = #tpu.dot_dimension_numbers<[1], [0], [0], [1], [0, 0, 1, 1], [], []>} : vector<16x128xbf16>, vector<128x256xbf16>, vector<16x256xf32> -> vector<16x256xf32>
    %c0_14 = arith.constant 0 : index
    %c0_15 = arith.constant 0 : index
    %32 = vector.load %arg6[%c0_14, %c0_15] : memref<1x256xf32, #tpu.memory_space<vmem>>, vector<1x256xf32>
    %33 = vector.broadcast %32 : vector<1x256xf32> to vector<16x256xf32>
    %34 = arith.addf %31, %33 : vector<16x256xf32>
    %35 = arith.negf %34 : vector<16x256xf32>
    %36 = math.exp %35 : vector<16x256xf32>
    %cst_16 = arith.constant 1.000000e+00 : f32
    %37 = vector.broadcast %cst_16 : f32 to vector<16x256xf32>
    %38 = arith.addf %37, %36 : vector<16x256xf32>
    %39 = arith.divf %37, %38 : vector<16x256xf32>
    %40 = arith.mulf %34, %39 : vector<16x256xf32>
    %41 = vector.extract_strided_slice %40 {offsets = [0, 0], sizes = [16, 128], strides = [1, 1]} : vector<16x256xf32> to vector<16x128xf32>
    %42 = vector.extract_strided_slice %40 {offsets = [0, 128], sizes = [16, 64], strides = [1, 1]} : vector<16x256xf32> to vector<16x64xf32>
    %43 = vector.extract_strided_slice %40 {offsets = [0, 192], sizes = [16, 64], strides = [1, 1]} : vector<16x256xf32> to vector<16x64xf32>
    %c0_17 = arith.constant 0 : index
    %c0_18 = arith.constant 0 : index
    %44 = vector.load %arg7[%c0_17, %c0_18] : memref<2x128xf32, #tpu.memory_space<vmem>>, vector<1x128xf32>
    %45 = vector.broadcast %44 : vector<1x128xf32> to vector<16x128xf32>
    %46 = arith.mulf %41, %45 : vector<16x128xf32>
    %c0_19 = arith.constant 0 : index
    %c0_20 = arith.constant 0 : index
    %47 = vector.load %arg8[%c0_19, %c0_20] : memref<2x128xf32, #tpu.memory_space<vmem>>, vector<1x128xf32>
    %48 = vector.broadcast %47 : vector<1x128xf32> to vector<16x128xf32>
    %49 = arith.addf %46, %48 : vector<16x128xf32>
    %cst_21 = arith.constant 1.250000e-01 : f32
    %50 = vector.broadcast %cst_21 : f32 to vector<16x128xf32>
    %51 = arith.mulf %49, %50 : vector<16x128xf32>
    %c1 = arith.constant 1 : index
    %c0_22 = arith.constant 0 : index
    %52 = vector.load %arg7[%c1, %c0_22] : memref<2x128xf32, #tpu.memory_space<vmem>>, vector<1x128xf32>
    %53 = vector.broadcast %52 : vector<1x128xf32> to vector<16x128xf32>
    %54 = arith.mulf %41, %53 : vector<16x128xf32>
    %c1_23 = arith.constant 1 : index
    %c0_24 = arith.constant 0 : index
    %55 = vector.load %arg8[%c1_23, %c0_24] : memref<2x128xf32, #tpu.memory_space<vmem>>, vector<1x128xf32>
    %56 = vector.broadcast %55 : vector<1x128xf32> to vector<16x128xf32>
    %57 = arith.addf %54, %56 : vector<16x128xf32>
    %c16_i32 = arith.constant 16 : i32
    %58 = arith.muli %arg1, %c16_i32 : i32
    %59 = tpu.iota {dimensions = array<i32: 0>} : vector<16x1xi32>
    %60 = vector.broadcast %58 : i32 to vector<16x1xi32>
    %61 = arith.addi %60, %59 : vector<16x1xi32>
    %c8_i32 = arith.constant 8 : i32
    %62 = vector.broadcast %c8_i32 : i32 to vector<16x1xi32>
    %63 = arith.cmpi slt, %61, %62 : vector<16x1xi32>
    %cst_25 = arith.constant 0.000000e+00 : f32
    %64 = vector.shape_cast %63 : vector<16x1xi1> to vector<16x1xi1>
    %65 = vector.broadcast %64 : vector<16x1xi1> to vector<16x128xi1>
    %66 = vector.broadcast %cst_25 : f32 to vector<16x128xf32>
    %67 = arith.select %65, %57, %66 : vector<16x128xi1>, vector<16x128xf32>
    %cst_26 = arith.constant 0.000000e+00 : f32
    %68 = vector.shape_cast %63 : vector<16x1xi1> to vector<16x1xi1>
    %69 = vector.broadcast %68 : vector<16x1xi1> to vector<16x64xi1>
    %70 = vector.broadcast %cst_26 : f32 to vector<16x64xf32>
    %71 = arith.select %69, %42, %70 : vector<16x64xi1>, vector<16x64xf32>
    %72 = arith.truncf %51 : vector<16x128xf32> to vector<16x128xbf16>
    %c0_27 = arith.constant 0 : index
    %c0_28 = arith.constant 0 : index
    %c0_29 = arith.constant 0 : index
    %73 = vector.load %arg9[%c0_27, %c0_28, %c0_29] : memref<1x16x128xbf16, #tpu.memory_space<vmem>>, vector<1x16x128xbf16>
    %74 = vector.shape_cast %73 : vector<1x16x128xbf16> to vector<16x128xbf16>
    %75 = vector.shape_cast %72 : vector<16x128xbf16> to vector<1x16x128xbf16>
    tpu.vector_store %arg9[%c0_27, %c0_28, %c0_29], %75 {strides = array<i32>} : memref<1x16x128xbf16, #tpu.memory_space<vmem>>, vector<1x16x128xbf16>,
    %76 = arith.truncf %67 : vector<16x128xf32> to vector<16x128xbf16>
    %c0_30 = arith.constant 0 : index
    %c0_31 = arith.constant 0 : index
    %c0_32 = arith.constant 0 : index
    %77 = vector.load %arg10[%c0_30, %c0_31, %c0_32] : memref<1x16x128xbf16, #tpu.memory_space<vmem>>, vector<1x16x128xbf16>
    %78 = vector.shape_cast %77 : vector<1x16x128xbf16> to vector<16x128xbf16>
    %79 = vector.shape_cast %76 : vector<16x128xbf16> to vector<1x16x128xbf16>
    tpu.vector_store %arg10[%c0_30, %c0_31, %c0_32], %79 {strides = array<i32>} : memref<1x16x128xbf16, #tpu.memory_space<vmem>>, vector<1x16x128xbf16>,
    %80 = arith.truncf %71 : vector<16x64xf32> to vector<16x64xbf16>
    %c0_33 = arith.constant 0 : index
    %c0_34 = arith.constant 0 : index
    %c0_35 = arith.constant 0 : index
    %81 = vector.load %arg11[%c0_33, %c0_34, %c0_35] : memref<1x16x64xbf16, #tpu.memory_space<vmem>>, vector<1x16x64xbf16>
    %82 = vector.shape_cast %81 : vector<1x16x64xbf16> to vector<16x64xbf16>
    %83 = vector.shape_cast %80 : vector<16x64xbf16> to vector<1x16x64xbf16>
    tpu.vector_store %arg11[%c0_33, %c0_34, %c0_35], %83 {strides = array<i32>} : memref<1x16x64xbf16, #tpu.memory_space<vmem>>, vector<1x16x64xbf16>,
    %84 = arith.truncf %43 : vector<16x64xf32> to vector<16x64xbf16>
    %c0_36 = arith.constant 0 : index
    %c0_37 = arith.constant 0 : index
    %c0_38 = arith.constant 0 : index
    %85 = vector.load %arg12[%c0_36, %c0_37, %c0_38] : memref<1x16x64xbf16, #tpu.memory_space<vmem>>, vector<1x16x64xbf16>
    %86 = vector.shape_cast %85 : vector<1x16x64xbf16> to vector<16x64xbf16>
    %87 = vector.shape_cast %84 : vector<16x64xbf16> to vector<1x16x64xbf16>
    tpu.vector_store %arg12[%c0_36, %c0_37, %c0_38], %87 {strides = array<i32>} : memref<1x16x64xbf16, #tpu.memory_space<vmem>>, vector<1x16x64xbf16>,
    return
  }
  func.func @transform_0(%arg0: i32, %arg1: i32) -> (i32, i32, i32) {
    %c0_i32 = arith.constant 0 : i32
    %c0_i32_0 = arith.constant 0 : i32
    return %arg0, %arg1, %c0_i32 : i32, i32, i32
  }
  func.func @transform_1(%arg0: i32, %arg1: i32) -> (i32, i32) {
    %c0_i32 = arith.constant 0 : i32
    %c0_i32_0 = arith.constant 0 : i32
    %c0_i32_1 = arith.constant 0 : i32
    return %c0_i32, %c0_i32_0 : i32, i32
  }
  func.func @transform_2(%arg0: i32, %arg1: i32) -> (i32, i32) {
    %c0_i32 = arith.constant 0 : i32
    %c0_i32_0 = arith.constant 0 : i32
    %c0_i32_1 = arith.constant 0 : i32
    return %c0_i32, %c0_i32_0 : i32, i32
  }
  func.func @transform_3(%arg0: i32, %arg1: i32) -> (i32, i32) {
    %c0_i32 = arith.constant 0 : i32
    %c0_i32_0 = arith.constant 0 : i32
    %c0_i32_1 = arith.constant 0 : i32
    return %c0_i32, %c0_i32_0 : i32, i32
  }
  func.func @transform_4(%arg0: i32, %arg1: i32) -> (i32, i32) {
    %c0_i32 = arith.constant 0 : i32
    %c0_i32_0 = arith.constant 0 : i32
    %c0_i32_1 = arith.constant 0 : i32
    return %c0_i32, %c0_i32_0 : i32, i32
  }
  func.func @transform_5(%arg0: i32, %arg1: i32) -> (i32, i32) {
    %c0_i32 = arith.constant 0 : i32
    %c0_i32_0 = arith.constant 0 : i32
    %c0_i32_1 = arith.constant 0 : i32
    return %c0_i32, %c0_i32_0 : i32, i32
  }
  func.func @transform_6(%arg0: i32, %arg1: i32) -> (i32, i32) {
    %c0_i32 = arith.constant 0 : i32
    %c0_i32_0 = arith.constant 0 : i32
    %c0_i32_1 = arith.constant 0 : i32
    return %c0_i32, %c0_i32_0 : i32, i32
  }
  func.func @transform_7(%arg0: i32, %arg1: i32) -> (i32, i32, i32) {
    %c0_i32 = arith.constant 0 : i32
    %c0_i32_0 = arith.constant 0 : i32
    return %arg0, %arg1, %c0_i32 : i32, i32, i32
  }
  func.func @transform_8(%arg0: i32, %arg1: i32) -> (i32, i32, i32) {
    %c0_i32 = arith.constant 0 : i32
    %c0_i32_0 = arith.constant 0 : i32
    return %arg0, %arg1, %c0_i32 : i32, i32, i32
  }
  func.func @transform_9(%arg0: i32, %arg1: i32) -> (i32, i32, i32) {
    %c0_i32 = arith.constant 0 : i32
    %c0_i32_0 = arith.constant 0 : i32
    return %arg0, %arg1, %c0_i32 : i32, i32, i32
  }
  func.func @transform_10(%arg0: i32, %arg1: i32) -> (i32, i32, i32) {
    %c0_i32 = arith.constant 0 : i32
    %c0_i32_0 = arith.constant 0 : i32
    return %arg0, %arg1, %c0_i32 : i32, i32, i32
  }
}

module attributes {stable_mosaic.version = 11 : i64} {
  func.func @gau_proj_kernel(%arg0: i32, %arg1: i32, %arg2: memref<1x16x128xf32, #tpu.memory_space<vmem>>, %arg3: memref<1x128xf32, #tpu.memory_space<vmem>>, %arg4: memref<1x128xf32, #tpu.memory_space<vmem>>, %arg5: memref<128x256xbf16, #tpu.memory_space<vmem>>, %arg6: memref<1x256xf32, #tpu.memory_space<vmem>>, %arg7: memref<2x128xf32, #tpu.memory_space<vmem>>, %arg8: memref<2x128xf32, #tpu.memory_space<vmem>>, %arg9: memref<1x16x128xbf16, #tpu.memory_space<vmem>>, %arg10: memref<1x16x128xbf16, #tpu.memory_space<vmem>>, %arg11: memref<1x16x64xbf16, #tpu.memory_space<vmem>>, %arg12: memref<1x16x64xbf16, #tpu.memory_space<vmem>>) attributes {dimension_semantics = [#tpu.dimension_semantics<parallel>, #tpu.dimension_semantics<parallel>], iteration_bounds = array<i64: 2, 1>, scalar_prefetch = 0 : i64, scratch_operands = 0 : i64, tpu.core_type = #tpu.core_type<tc>, window_params = [{transform_indices = @transform_0, window_bounds = array<i64: 1, 16, 128>}, {pipeline_mode = #tpu.pipeline_mode<synchronous>, transform_indices = @transform_1, window_bounds = array<i64: 1, 128>}, {pipeline_mode = #tpu.pipeline_mode<synchronous>, transform_indices = @transform_2, window_bounds = array<i64: 1, 128>}, {pipeline_mode = #tpu.pipeline_mode<synchronous>, transform_indices = @transform_3, window_bounds = array<i64: 128, 256>}, {pipeline_mode = #tpu.pipeline_mode<synchronous>, transform_indices = @transform_4, window_bounds = array<i64: 1, 256>}, {pipeline_mode = #tpu.pipeline_mode<synchronous>, transform_indices = @transform_5, window_bounds = array<i64: 2, 128>}, {pipeline_mode = #tpu.pipeline_mode<synchronous>, transform_indices = @transform_6, window_bounds = array<i64: 2, 128>}, {transform_indices = @transform_7, window_bounds = array<i64: 1, 16, 128>}, {transform_indices = @transform_8, window_bounds = array<i64: 1, 16, 128>}, {transform_indices = @transform_9, window_bounds = array<i64: 1, 16, 64>}, {transform_indices = @transform_10, window_bounds = array<i64: 1, 16, 64>}]} {
    %c0 = arith.constant 0 : index
    %c0_0 = arith.constant 0 : index
    %c0_1 = arith.constant 0 : index
    %0 = vector.load %arg2[%c0, %c0_0, %c0_1] : memref<1x16x128xf32, #tpu.memory_space<vmem>>, vector<1x16x128xf32>
    %1 = vector.shape_cast %0 : vector<1x16x128xf32> to vector<16x128xf32>
    %c0_2 = arith.constant 0 : index
    %c0_3 = arith.constant 0 : index
    %2 = vector.load %arg3[%c0_2, %c0_3] : memref<1x128xf32, #tpu.memory_space<vmem>>, vector<1x128xf32>
    %c0_4 = arith.constant 0 : index
    %c0_5 = arith.constant 0 : index
    %3 = vector.load %arg4[%c0_4, %c0_5] : memref<1x128xf32, #tpu.memory_space<vmem>>, vector<1x128xf32>
    %cst = arith.constant dense<0.000000e+00> : vector<16xf32>
    %4 = vector.multi_reduction <add>, %1, %cst [1] : vector<16x128xf32> to vector<16xf32>
    %5 = vector.shape_cast %4 : vector<16xf32> to vector<16x1xf32>
    %cst_6 = arith.constant 3.125000e-02 : f32
    %6 = vector.broadcast %cst_6 : f32 to vector<16x1xf32>
    %7 = arith.mulf %5, %6 : vector<16x1xf32>
    %8 = vector.broadcast %7 : vector<16x1xf32> to vector<16x128xf32>
    %9 = arith.subf %1, %8 : vector<16x128xf32>
    %10 = tpu.iota {dimensions = array<i32: 1>} : vector<16x128xi32>
    %c32_i32 = arith.constant 32 : i32
    %11 = vector.broadcast %c32_i32 : i32 to vector<16x128xi32>
    %12 = arith.cmpi slt, %10, %11 : vector<16x128xi32>
    %cst_7 = arith.constant 0.000000e+00 : f32
    %13 = vector.broadcast %cst_7 : f32 to vector<16x128xf32>
    %14 = arith.select %12, %9, %13 : vector<16x128xi1>, vector<16x128xf32>
    %15 = arith.mulf %14, %14 : vector<16x128xf32>
    %cst_8 = arith.constant dense<0.000000e+00> : vector<16xf32>
    %16 = vector.multi_reduction <add>, %15, %cst_8 [1] : vector<16x128xf32> to vector<16xf32>
    %17 = vector.shape_cast %16 : vector<16xf32> to vector<16x1xf32>
    %cst_9 = arith.constant 3.125000e-02 : f32
    %18 = vector.broadcast %cst_9 : f32 to vector<16x1xf32>
    %19 = arith.mulf %17, %18 : vector<16x1xf32>
    %cst_10 = arith.constant 9.99999974E-6 : f32
    %20 = vector.broadcast %cst_10 : f32 to vector<16x1xf32>
    %21 = arith.addf %19, %20 : vector<16x1xf32>
    %22 = math.rsqrt %21 : vector<16x1xf32>
    %23 = vector.broadcast %22 : vector<16x1xf32> to vector<16x128xf32>
    %24 = arith.mulf %9, %23 : vector<16x128xf32>
    %25 = vector.broadcast %2 : vector<1x128xf32> to vector<16x128xf32>
    %26 = arith.mulf %24, %25 : vector<16x128xf32>
    %27 = vector.broadcast %3 : vector<1x128xf32> to vector<16x128xf32>
    %28 = arith.addf %26, %27 : vector<16x128xf32>
    %29 = arith.truncf %28 : vector<16x128xf32> to vector<16x128xbf16>
    %c0_11 = arith.constant 0 : index
    %c0_12 = arith.constant 0 : index
    %30 = vector.load %arg5[%c0_11, %c0_12] : memref<128x256xbf16, #tpu.memory_space<vmem>>, vector<128x256xbf16>
    %cst_13 = arith.constant dense<0.000000e+00> : vector<16x256xf32>
    %31 = tpu.matmul %29, %30, %cst_13 {dimension_numbers = #tpu.dot_dimension_numbers<[1], [0], [0], [1], [0, 0, 1, 1], [], []>} : vector<16x128xbf16>, vector<128x256xbf16>, vector<16x256xf32> -> vector<16x256xf32>
    %c0_14 = arith.constant 0 : index
    %c0_15 = arith.constant 0 : index
    %32 = vector.load %arg6[%c0_14, %c0_15] : memref<1x256xf32, #tpu.memory_space<vmem>>, vector<1x256xf32>
    %33 = vector.broadcast %32 : vector<1x256xf32> to vector<16x256xf32>
    %34 = arith.addf %31, %33 : vector<16x256xf32>
    %35 = arith.negf %34 : vector<16x256xf32>
    %36 = math.exp %35 : vector<16x256xf32>
    %cst_16 = arith.constant 1.000000e+00 : f32
    %37 = vector.broadcast %cst_16 : f32 to vector<16x256xf32>
    %38 = arith.addf %37, %36 : vector<16x256xf32>
    %39 = arith.divf %37, %38 : vector<16x256xf32>
    %40 = arith.mulf %34, %39 : vector<16x256xf32>
    %41 = vector.extract_strided_slice %40 {offsets = [0, 0], sizes = [16, 128], strides = [1, 1]} : vector<16x256xf32> to vector<16x128xf32>
    %42 = vector.extract_strided_slice %40 {offsets = [0, 128], sizes = [16, 64], strides = [1, 1]} : vector<16x256xf32> to vector<16x64xf32>
    %43 = vector.extract_strided_slice %40 {offsets = [0, 192], sizes = [16, 64], strides = [1, 1]} : vector<16x256xf32> to vector<16x64xf32>
    %c0_17 = arith.constant 0 : index
    %c0_18 = arith.constant 0 : index
    %44 = vector.load %arg7[%c0_17, %c0_18] : memref<2x128xf32, #tpu.memory_space<vmem>>, vector<1x128xf32>
    %45 = vector.broadcast %44 : vector<1x128xf32> to vector<16x128xf32>
    %46 = arith.mulf %41, %45 : vector<16x128xf32>
    %c0_19 = arith.constant 0 : index
    %c0_20 = arith.constant 0 : index
    %47 = vector.load %arg8[%c0_19, %c0_20] : memref<2x128xf32, #tpu.memory_space<vmem>>, vector<1x128xf32>
    %48 = vector.broadcast %47 : vector<1x128xf32> to vector<16x128xf32>
    %49 = arith.addf %46, %48 : vector<16x128xf32>
    %cst_21 = arith.constant 1.250000e-01 : f32
    %50 = vector.broadcast %cst_21 : f32 to vector<16x128xf32>
    %51 = arith.mulf %49, %50 : vector<16x128xf32>
    %c1 = arith.constant 1 : index
    %c0_22 = arith.constant 0 : index
    %52 = vector.load %arg7[%c1, %c0_22] : memref<2x128xf32, #tpu.memory_space<vmem>>, vector<1x128xf32>
    %53 = vector.broadcast %52 : vector<1x128xf32> to vector<16x128xf32>
    %54 = arith.mulf %41, %53 : vector<16x128xf32>
    %c1_23 = arith.constant 1 : index
    %c0_24 = arith.constant 0 : index
    %55 = vector.load %arg8[%c1_23, %c0_24] : memref<2x128xf32, #tpu.memory_space<vmem>>, vector<1x128xf32>
    %56 = vector.broadcast %55 : vector<1x128xf32> to vector<16x128xf32>
    %57 = arith.addf %54, %56 : vector<16x128xf32>
    %c16_i32 = arith.constant 16 : i32
    %58 = arith.muli %arg1, %c16_i32 : i32
    %59 = tpu.iota {dimensions = array<i32: 0>} : vector<16x1xi32>
    %60 = vector.broadcast %58 : i32 to vector<16x1xi32>
    %61 = arith.addi %60, %59 : vector<16x1xi32>
    %c8_i32 = arith.constant 8 : i32
    %62 = vector.broadcast %c8_i32 : i32 to vector<16x1xi32>
    %63 = arith.cmpi slt, %61, %62 : vector<16x1xi32>
    %cst_25 = arith.constant 0.000000e+00 : f32
    %64 = vector.shape_cast %63 : vector<16x1xi1> to vector<16x1xi1>
    %65 = vector.broadcast %64 : vector<16x1xi1> to vector<16x128xi1>
    %66 = vector.broadcast %cst_25 : f32 to vector<16x128xf32>
    %67 = arith.select %65, %57, %66 : vector<16x128xi1>, vector<16x128xf32>
    %cst_26 = arith.constant 0.000000e+00 : f32
    %68 = vector.shape_cast %63 : vector<16x1xi1> to vector<16x1xi1>
    %69 = vector.broadcast %68 : vector<16x1xi1> to vector<16x64xi1>
    %70 = vector.broadcast %cst_26 : f32 to vector<16x64xf32>
    %71 = arith.select %69, %42, %70 : vector<16x64xi1>, vector<16x64xf32>
    %72 = arith.truncf %51 : vector<16x128xf32> to vector<16x128xbf16>
    %c0_27 = arith.constant 0 : index
    %c0_28 = arith.constant 0 : index
    %c0_29 = arith.constant 0 : index
    %73 = vector.load %arg9[%c0_27, %c0_28, %c0_29] : memref<1x16x128xbf16, #tpu.memory_space<vmem>>, vector<1x16x128xbf16>
    %74 = vector.shape_cast %73 : vector<1x16x128xbf16> to vector<16x128xbf16>
    %75 = vector.shape_cast %72 : vector<16x128xbf16> to vector<1x16x128xbf16>
    tpu.vector_store %arg9[%c0_27, %c0_28, %c0_29], %75 {strides = array<i32>} : memref<1x16x128xbf16, #tpu.memory_space<vmem>>, vector<1x16x128xbf16>,
    %76 = arith.truncf %67 : vector<16x128xf32> to vector<16x128xbf16>
    %c0_30 = arith.constant 0 : index
    %c0_31 = arith.constant 0 : index
    %c0_32 = arith.constant 0 : index
    %77 = vector.load %arg10[%c0_30, %c0_31, %c0_32] : memref<1x16x128xbf16, #tpu.memory_space<vmem>>, vector<1x16x128xbf16>
    %78 = vector.shape_cast %77 : vector<1x16x128xbf16> to vector<16x128xbf16>
    %79 = vector.shape_cast %76 : vector<16x128xbf16> to vector<1x16x128xbf16>
    tpu.vector_store %arg10[%c0_30, %c0_31, %c0_32], %79 {strides = array<i32>} : memref<1x16x128xbf16, #tpu.memory_space<vmem>>, vector<1x16x128xbf16>,
    %80 = arith.truncf %71 : vector<16x64xf32> to vector<16x64xbf16>
    %c0_33 = arith.constant 0 : index
    %c0_34 = arith.constant 0 : index
    %c0_35 = arith.constant 0 : index
    %81 = vector.load %arg11[%c0_33, %c0_34, %c0_35] : memref<1x16x64xbf16, #tpu.memory_space<vmem>>, vector<1x16x64xbf16>
    %82 = vector.shape_cast %81 : vector<1x16x64xbf16> to vector<16x64xbf16>
    %83 = vector.shape_cast %80 : vector<16x64xbf16> to vector<1x16x64xbf16>
    tpu.vector_store %arg11[%c0_33, %c0_34, %c0_35], %83 {strides = array<i32>} : memref<1x16x64xbf16, #tpu.memory_space<vmem>>, vector<1x16x64xbf16>,
    %84 = arith.truncf %43 : vector<16x64xf32> to vector<16x64xbf16>
    %c0_36 = arith.constant 0 : index
    %c0_37 = arith.constant 0 : index
    %c0_38 = arith.constant 0 : index
    %85 = vector.load %arg12[%c0_36, %c0_37, %c0_38] : memref<1x16x64xbf16, #tpu.memory_space<vmem>>, vector<1x16x64xbf16>
    %86 = vector.shape_cast %85 : vector<1x16x64xbf16> to vector<16x64xbf16>
    %87 = vector.shape_cast %84 : vector<16x64xbf16> to vector<1x16x64xbf16>
    tpu.vector_store %arg12[%c0_36, %c0_37, %c0_38], %87 {strides = array<i32>} : memref<1x16x64xbf16, #tpu.memory_space<vmem>>, vector<1x16x64xbf16>,
    return
  }
  func.func @transform_0(%arg0: i32, %arg1: i32) -> (i32, i32, i32) {
    %c0_i32 = arith.constant 0 : i32
    %c0_i32_0 = arith.constant 0 : i32
    return %arg0, %arg1, %c0_i32 : i32, i32, i32
  }
  func.func @transform_1(%arg0: i32, %arg1: i32) -> (i32, i32) {
    %c0_i32 = arith.constant 0 : i32
    %c0_i32_0 = arith.constant 0 : i32
    %c0_i32_1 = arith.constant 0 : i32
    return %c0_i32, %c0_i32_0 : i32, i32
  }
  func.func @transform_2(%arg0: i32, %arg1: i32) -> (i32, i32) {
    %c0_i32 = arith.constant 0 : i32
    %c0_i32_0 = arith.constant 0 : i32
    %c0_i32_1 = arith.constant 0 : i32
    return %c0_i32, %c0_i32_0 : i32, i32
  }
  func.func @transform_3(%arg0: i32, %arg1: i32) -> (i32, i32) {
    %c0_i32 = arith.constant 0 : i32
    %c0_i32_0 = arith.constant 0 : i32
    %c0_i32_1 = arith.constant 0 : i32
    return %c0_i32, %c0_i32_0 : i32, i32
  }
  func.func @transform_4(%arg0: i32, %arg1: i32) -> (i32, i32) {
    %c0_i32 = arith.constant 0 : i32
    %c0_i32_0 = arith.constant 0 : i32
    %c0_i32_1 = arith.constant 0 : i32
    return %c0_i32, %c0_i32_0 : i32, i32
  }
  func.func @transform_5(%arg0: i32, %arg1: i32) -> (i32, i32) {
    %c0_i32 = arith.constant 0 : i32
    %c0_i32_0 = arith.constant 0 : i32
    %c0_i32_1 = arith.constant 0 : i32
    return %c0_i32, %c0_i32_0 : i32, i32
  }
  func.func @transform_6(%arg0: i32, %arg1: i32) -> (i32, i32) {
    %c0_i32 = arith.constant 0 : i32
    %c0_i32_0 = arith.constant 0 : i32
    %c0_i32_1 = arith.constant 0 : i32
    return %c0_i32, %c0_i32_0 : i32, i32
  }
  func.func @transform_7(%arg0: i32, %arg1: i32) -> (i32, i32, i32) {
    %c0_i32 = arith.constant 0 : i32
    %c0_i32_0 = arith.constant 0 : i32
    return %arg0, %arg1, %c0_i32 : i32, i32, i32
  }
  func.func @transform_8(%arg0: i32, %arg1: i32) -> (i32, i32, i32) {
    %c0_i32 = arith.constant 0 : i32
    %c0_i32_0 = arith.constant 0 : i32
    return %arg0, %arg1, %c0_i32 : i32, i32, i32
  }
  func.func @transform_9(%arg0: i32, %arg1: i32) -> (i32, i32, i32) {
    %c0_i32 = arith.constant 0 : i32
    %c0_i32_0 = arith.constant 0 : i32
    return %arg0, %arg1, %c0_i32 : i32, i32, i32
  }
  func.func @transform_10(%arg0: i32, %arg1: i32) -> (i32, i32, i32) {
    %c0_i32 = arith.constant 0 : i32
    %c0_i32_0 = arith.constant 0 : i32
    return %arg0, %arg1, %c0_i32 : i32, i32, i32
  }
}

</mosaic_0001>

<bundles_post_ra>
// kernel: tpu_custom_call.1
= control target key start
LH: loop header
LB: loop body
LE: loop exit
PB: predicated region body
PF: predicated region fallthrough
CT: control target
= control target key end

     0   :  { %s1982_s0 = inlined_call_operand.hbm [shape: f32[2,16,128], index: 0, kind: input, shape index: {}]   ;;  %s1983_s1 = inlined_call_operand.vmem [shape: f32[1,128], index: 1, kind: input, shape index: {}]   ;;  %s1984_s2 = inlined_call_operand.hbm [shape: f32[1,128], index: 2, kind: input, shape index: {}]   ;;  %s1985_s3 = inlined_call_operand.hbm [shape: bf16[128,256], index: 3, kind: input, shape index: {}]   ;;  %s1986_s4 = inlined_call_operand.vmem [shape: f32[1,256], index: 4, kind: input, shape index: {}]   ;;  %s1987_s5 = inlined_call_operand.vmem [shape: f32[2,128], index: 5, kind: input, shape index: {}]   ;;  %s1988_s6 = inlined_call_operand.vmem [shape: f32[2,128], index: 6, kind: input, shape index: {}]   ;;  %s1989_s7 = inlined_call_operand.hbm [shape: bf16[2,16,128], index: 7, kind: output, shape index: {0}]   ;;  %s1990_s8 = inlined_call_operand.hbm [shape: bf16[2,16,128], index: 8, kind: output, shape index: {1}]   ;;  %s1991_s9 = inlined_call_operand.hbm [shape: bf16[2,16,64], index: 9, kind: output, shape index: {2}]   ;;  %s1992_s10 = inlined_call_operand.hbm [shape: bf16[2,16,64], index: 10, kind: output, shape index: {3}]  }
   0x1   :  { %2010 = sst [smem:[#allocation22_spill]] %s1982_s0 }
   0x2   :  { %2011 = sst [smem:[#allocation23_spill]] %s1984_s2 }
   0x3   :  { %2012 = sst [smem:[#allocation24_spill]] %s1989_s7 }
   0x4   :  { %2013 = sst [smem:[#allocation25_spill]] %s1990_s8 }
   0x5   :  { %2014 = sst [smem:[#allocation26_spill]] %s1991_s9 }
   0x6   :  { %2015 = sst [smem:[#allocation27_spill]] %s1992_s10 }
   0x7   :  { %16 = vsyncpa [#allocation3], 0 }
   0x8   :  { %18 = vsyncpa [#allocation3 + $0x1], 0 }
   0x9   :  { %19 = vsyncpa [#allocation6], 0 }
   0xa   :  { %20 = vsyncpa [#allocation4], 0 }
   0xb   :  { %22 = vsyncpa [#allocation4 + $0x1], 0 }
   0xc   :  { %23 = vsyncpa [#allocation10], 0 }
   0xd   :  { %25 = vsyncpa [#allocation10 + $0x1], 0 }
   0xe   :  { %26 = vsyncpa [#allocation13], 0 }
   0xf   :  { %28 = vsyncpa [#allocation13 + $0x1], 0  ;;  %s1632_s13 = smov 0   ;;  %s1634_s14 = smov 0  }
  0x10   :  { %s1636_s15 = smov 0   ;;  %s1638_s16 = smov 0  }
  0x11   :  { %s1640_s17 = smov 0   ;;  %s1642_s18 = smov 0  }
  0x12 LB: > { %2016 = sst [smem:[#allocation19_spill]] %s1541_s13  ;;  %s1663_s19 = sadd.s32 4294967295, %s1561_s18   ;;  %s1561_s18 = sphi %s1642_s18, %s34_s18   ;;  %s1557_s17 = sphi %s1640_s17, %s2051_s17   ;;  %s1553_s16 = sphi %s1638_s16, %s2050_s16   ;;  %s1549_s15 = sphi %s1636_s15, %s2049_s15   ;;  %s1545_s14 = sphi %s1634_s14, %s2048_s14   ;;  %s1541_s13 = sphi %s1632_s13, %s2047_s13  }
  0x13   : > { %2017 = sst [smem:[#allocation20_spill]] %s1561_s18  ;;  %s1994_s20 = sadd.s32 4294967294, %s1561_s18  }
  0x14   : > { %p62_p0 = scmp.ne.s32.totalorder %s1549_s15, %s1545_s14  ;;  %p63_p1 = scmp.eq.s32.totalorder %s1561_s18, 0 }
  0x15   : > { %p68_p2 = scmp.ne.s32.totalorder %s1545_s14, %s1541_s13  ;;  %p1995_p3 = scmp.eq.s32.totalorder %s1663_s19, 0 }
  0x16   : > { %p220_p4 = scmp.eq.s32.totalorder %s1663_s19, 1  ;;  %p1673_p5 = por %p63_p1, %p62_p0 }
  0x17   : > { %p226_p6 = scmp.eq.s32.totalorder %s1994_s20, 1  ;;  %p1681_p7 = por %p1995_p3, %p68_p2 }
  0x18   : > { %p1685_p8 = por %p220_p4, %p62_p0  ;;  %p1077_p10 = scmp.ge.s32.totalorder %s1561_s18, 1 }
  0x19   : > { %s2019_s22 = scalar_select %p1681_p7, 1, 0 }
  0x1a   : > { %s2020_s23 = scalar_select %p1685_p8, 1, 0 }
  0x1b   : > { %p1689_p9 = por %p226_p6, %p68_p2  ;;  %p317_p11 = scmp.lt.s32.totalorder %s1561_s18, 3 }
  0x1c   : > { %s1563_s26 = smov [#allocation5]   ;;  %p1206_p1 = scmp.lt.s32.totalorder %s1561_s18, 2 }
  0x1d   : > { %s2021_s24 = scalar_select %p1689_p9, 1, 0 }
  0x1e   : > { %p1696_p13 = pnand %p1077_p10, %p317_p11  ;;  %s333_s27 = sshll.u32 %s1563_s26, 4  ;;  %s334_s27 = int_to_ptr.vmem [resolvable:$true] %s333_s27 }
  0x1f   : > { %2022 = sst [smem:[#allocation21_spill]] %s2021_s24  ;;  %p1705_p4 = pnand %p1206_p1, %p1673_p5 }
  0x20   : > { %s2023_s25 = scalar_select %p1696_p13, 1, 0 }
  0x21   : > { %p1180_p0 = pneg %p1696_p13  ;;  %s1564_s29 = smov [#allocation7]  }
  0x22   : > { %s2024_s28 = scalar_select %p1705_p4, 1, 0 }
  0x23   : > { %s343_s30 = sshll.u32 %s1564_s29, 4  ;;  %p1711_p2 = pnand %p1180_p0, %p1995_p3  ;;  %s344_s30 = int_to_ptr.vmem [resolvable:$true] %s343_s30 }
  0x24   : > { %s1322_s12 = scalar_lea.vmem %s334_s27, 16  ;;  %s1329_s21 = scalar_lea.vmem %s334_s27, 32 }
  0x25   : > { %p1313_p6 = pneg %p1711_p2  ;;  %p1323_p10 = scmp.ne.s32.totalorder %s334_s27, %s1322_s12 }
  0x26   : > { %p1330_p1 = scmp.lt.s32.totalorder %s334_s27, %s334_s27  ;;  %p1331_p12 = scmp.lt.s32.totalorder %s1329_s21, %s1322_s12 }
  0x27   : > { %p1325_p5 = pnand %p1323_p10, %p1313_p6 }
  0x28   : > { %p1332_p9 = por %p1331_p12, %p1330_p1 }
  0x29   : > { %p1326_p11 = pneg %p1325_p5 }
  0x2b   : > { %p1333_p8 = pnand %p1332_p9, %p1326_p11 }
  0x2d   : > { %1336 = shalt.err (!%p1333_p8)
}
  0x2e   : > { %s2026_s2 = sld [smem:[#allocation23_spill]]  ;;  %s1348_s20 = scalar_lea.vmem %s344_s30, 2048 }
  0x2f   : > { %p1349_p0 = scmp.ne.s32.totalorder %s344_s30, %s1348_s20  ;;  %p1356_p5 = scmp.lt.s32.totalorder %s344_s30, %s344_s30 }
  0x30   : > { %p1357_p7 = scmp.lt.s32.totalorder %s1348_s20, %s1348_s20 }
  0x31   : > { %p1351_p3 = pnand %p1349_p0, %p1313_p6 }
  0x32   : > { %p1358_p13 = por %p1357_p7, %p1356_p5 }
  0x33   : > { %p1352_p10 = pneg %p1351_p3 }
  0x34   : > { %1183 = dma.hbm_to_vmem [thread:$0]  (!%p1711_p2), %s2026_s2, 16, %s334_s27, [#allocation6]  }
  0x35   : > { %p1359_p4 = pnand %p1358_p13, %p1352_p10 }
  0x37   : > { %1362 = shalt.err (!%p1359_p4)
}
  0x38   : > { %s1565_s12 = smov 128   ;;  %s1566_s21 = smov 8  }
  0x39   : > { %1186 = dma.hbm_to_vmem [thread:$0]  (!%p1711_p2), %s1985_s3, 2048, %s344_s30, [#allocation6], %s1565_s12, %s1565_s12, %s1566_s21  }
  0x3a   : > { %s366_s20 = sand.u32 1, %s1549_s15   ;;  %s46_s29 = sadd.s32 1, %s1557_s17 }
  0x3b   : > { %s1081_s2 = sshll.u32 %s366_s20, 4  ;;  %p48_p3 = scmp.ge.s32.totalorder %s46_s29, 2 }
  0x3c   : > { %s1140_s18 = sshll.u32 %s1557_s17, 8  ;;  %s370_s24 = scalar_lea.vmem [#allocation2], %s1081_s2 }
  0x3d   : > { %s379_s13 = sshll.u32 %s370_s24, 4  ;;  %s2053_s29 = smov (%p48_p3, %s46_s29), 0  ;;  %s380_s13 = int_to_ptr.vmem [resolvable:$true] %s379_s13 }
  0x3e   : > { %s2027_s0 = sld [smem:[#allocation22_spill]]  ;;  %s55_s9 = sadd.s32 1, %s1549_s15 }
  0x3f   : > { %s50_s8 = ssub.s32 %s1557_s17, %s2053_s29  ;;  %s367_s30 = scalar_lea.sflag [#allocation3], %s366_s20 }
  0x40   : > { %p1747_p7 = scmp.eq.s32.totalorder %s50_s8, 0  ;;  %p2029_p8 = scmp.ne.s32.totalorder %s2024_s28, 0 }
  0x41   : > { %s1376_s26 = scalar_lea.vmem %s380_s13, 256  ;;  %s1567_s2 = smov [#allocation2]  }
  0x42   : > { %p1365_p9 = pneg %p2029_p8  ;;  %p1377_p12 = scmp.ne.s32.totalorder %s380_s13, %s1376_s26 }
  0x43   : > { %s1381_s24 = sshll.u32 %s1567_s2, 4  ;;  %s1382_s24 = int_to_ptr.vmem [resolvable:$false] %s1381_s24 }
  0x44   : > { %s378_s11 = scalar_lea.hbm %s2027_s0, %s1140_s18  ;;  %p1379_p13 = pnand %p1377_p12, %p1365_p9 }
  0x45   : > { %s1383_s7 = scalar_lea.vmem %s1382_s24, 512  ;;  %p1384_p2 = scmp.lt.s32.totalorder %s380_s13, %s1382_s24 }
  0x46   : > { %p1380_p4 = pneg %p1379_p13  ;;  %p1385_p6 = scmp.lt.s32.totalorder %s1383_s7, %s1376_s26 }
  0x48   : > { %p1386_p11 = por %p1385_p6, %p1384_p2 }
  0x4a   : > { %p1387_p1 = pnand %p1386_p11, %p1380_p4 }
  0x4c   : > { %1390 = shalt.err (!%p1387_p1)
}
  0x4d   : > { %1190 = dma.hbm_to_vmem [thread:$0]  (!%p2029_p8), %s378_s11, 256, %s380_s13, %s367_s30, %s1565_s12, %s1565_s12, %s1566_s21  }
  0x4e   : > { %s1761_s8 = scalar_select %p1747_p7, %s1549_s15, %s55_s9  }
  0x4f   : > { %p2030_p0 = scmp.ne.s32.totalorder %s2023_s25, 0 }
  0x50   : > { %s1766_s10 = sand.u32 (!%p2030_p0), 1, %s1545_s14   ;;  %p2031_p10 = scmp.ne.s32.totalorder (!%p2030_p0), %s2019_s22, 0 }
  0x51   : > { %391 = sbr.rel (%p2030_p0) target bundleno = 787 (0x313), region = 48  ;;  %s1085_s18 = sshll.u32 (!%p2030_p0), %s1766_s10, 4 }
  0x52   : > { %s394_s28 = scalar_lea.sflag (!%p2030_p0), [#allocation3], %s1766_s10  ;;  %s397_s20 = scalar_lea.vmem (!%p2030_p0), [#allocation2], %s1085_s18 }
  0x56   : > { %1520 = dma.done.wait (%p2031_p10), %s394_s28, 256  }
  0x57   : > { %1522 = vsyncadd (%p2031_p10), %s394_s28, 4294967040  ;;  %p2032_p5 = scmp.eq.s32.totalorder %s1663_s19, 0 }
  0x59   : > { %1524 = dma.done.wait (%p2032_p5), [#allocation6], 2064   ;;  %p2033_p3 = pmov %p2032_p5 }
  0x5a   : > { %v463_v0 = vld [vmem:[%s397_s20] sm:$0xff]  ;;  %v464_v1 = vld [vmem:[%s397_s20 + $0x8] sm:$0xff]  ;;  %v475_v4 = vlaneseq  ;;  %v1568_v25 = vmov 0   ;;  %s1783_s22 = sshll.u32 %s1766_s10, 3  ;;  %vm765_vm1 = vcmask 519168   ;;  %v1569_v48 = vmov 0.0|0.0  }
  0x5b   : > { %1526 = vsyncadd (%p2033_p3), [#allocation6], 4294965232  ;;  %467 = vadd.xlane.f32.xlu0 %v463_v0  ;;  %v1267_v2 = vld [vmem:[#allocation7 + $0x74] ss:$8 sps:$4 sm:$0xff]   ;;  %v1269_v3 = vld [vmem:[#allocation7 + $0x70] ss:$8 sps:$4 sm:$0xff]   ;;  %651 = vmatprep.mubr.bf16.mxu0 %v1568_v25 }
  0x5c   : > { %619 = vmatprep.subr.bf16.mxu0 %v1267_v2  ;;  %v476_v5 = vand.u32 127, %v475_v4  ;;  %v1270_v16 = vld [vmem:[#allocation7 + $0x64] ss:$8 sps:$4 sm:$0xff]   ;;  %v1272_v17 = vld [vmem:[#allocation7 + $0x60] ss:$8 sps:$4 sm:$0xff]   ;;  %s1786_s25 = scalar_lea.vmem [#allocation11], %s1783_s22 }
  0x5d   : > { %620 = vmatpush1.bf16.msra.mxu0 %v1269_v3  ;;  %v1273_v18 = vld [vmem:[#allocation7 + $0x54] ss:$8 sps:$4 sm:$0xff]   ;;  %v1275_v19 = vld [vmem:[#allocation7 + $0x50] ss:$8 sps:$4 sm:$0xff]   ;;  %v1276_v20 = vld [vmem:[#allocation7 + $0x44] ss:$8 sps:$4 sm:$0xff]  }
  0x5e   : > { %vm477_vm0 = vcmp.lt.s32.totalorder %v476_v5, 32  ;;  %621 = vmatprep.subr.bf16.mxu0 %v1270_v16  ;;  %v1278_v21 = vld [vmem:[#allocation7 + $0x40] ss:$8 sps:$4 sm:$0xff]   ;;  %v1279_v22 = vld [vmem:[#allocation7 + $0x34] ss:$8 sps:$4 sm:$0xff]   ;;  %v530_v49 = vshrl.u32 %v475_v4, 7 }
  0x5f   : > { %469 = vadd.xlane.f32.xlu0 %v464_v1  ;;  %v1281_v23 = vld [vmem:[#allocation7 + $0x30] ss:$8 sps:$4 sm:$0xff]   ;;  %v1282_v24 = vld [vmem:[#allocation7 + $0x24] ss:$8 sps:$4 sm:$0xff]   ;;  %v1284_v26 = vld [vmem:[#allocation7 + $0x20] ss:$8 sps:$4 sm:$0xff]  }
  0x60   : > { %v1285_v27 = vld [vmem:[#allocation7 + $0x14] ss:$8 sps:$4 sm:$0xff]   ;;  %v1287_v28 = vld [vmem:[#allocation7 + $0x10] ss:$8 sps:$4 sm:$0xff]   ;;  %v1288_v29 = vld [vmem:[#allocation7 + $0x4] ss:$8 sps:$4 sm:$0xff]  }
  0x61   : > { %622 = vmatpush1.bf16.msra.mxu0 %v1272_v17  ;;  %v1290_v30 = vld [vmem:[#allocation7] ss:$8 sps:$4 sm:$0xff]   ;;  %v1092_v39 = vld [vmem:[%s1983_s1] ss:$0 sm:$0xff]  ;;  %767 = vst.msk [vmem:[%s1786_s25 + $0x4] sm:$0xf] %vm765_vm1, %v1569_v48 }
  0x62   : > { %623 = vmatprep.subr.bf16.mxu0 %v1273_v18  ;;  %v1093_v43 = vld [vmem:[#allocation5] ss:$0 sm:$0xff]  ;;  %v531_v50 = vsub.s32 0, %v530_v49  ;;  %v535_v52 = vsub.s32 1, %v530_v49  ;;  %v1117_v16 = vld [vmem:[%s1988_s6 + $0x1] ss:$0 sm:$0xff] }
  0x63   : > { %v527_v51 = vld [vmem:[%s1986_s4] sm:$0x3]  ;;  %s787_s7 = sand.u32 1, %s1663_s19   ;;  %s1808_s20 = sshll.u32 %s1553_s16, 7 }
  0x64   : > { %v532_v53 = vrot.slane %v527_v51, %v531_v50  ;;  %v536_v54 = vrot.slane %v527_v51, %v535_v52  ;;  %s442_s9 = scalar_lea.vmem [#allocation9], %s1783_s22  ;;  %s849_s12 = sshll.u32 %s1786_s25, 4  ;;  %s1823_s12 = int_to_ptr.vmem [resolvable:$true] %s849_s12 }
  0x65   : > { %624 = vmatpush1.bf16.msra.mxu0 %v1275_v19  ;;  %s831_s13 = sshll.u32 %s442_s9, 4  ;;  %s2007_s19 = smov 64   ;;  %s1821_s13 = int_to_ptr.vmem [resolvable:$true] %s831_s13 }
  0x66   : > { %625 = vmatprep.subr.bf16.mxu0 %v1276_v20  ;;  %s2034_s11 = sld [smem:[#allocation25_spill]]  ;;  %s2009_s30 = scalar_lea.vmem [#allocation8], %s1783_s22 }
  0x67   : > { %s1828_s26 = sshll.u32 %s2009_s30, 4  ;;  %s2035_s24 = sld [smem:[#allocation26_spill]]  ;;  %s1894_s26 = int_to_ptr.vmem [resolvable:$true] %s1828_s26 }
  0x68   : > { %s1836_s28 = scalar_lea.sflag [#allocation10], %s787_s7  ;;  %s1391_s16 = scalar_lea.vmem %s1821_s13, 128 }
  0x69   : > { %626 = vmatpush1.bf16.msra.mxu0 %v1278_v21  ;;  %v1115_v21 = vld [vmem:[%s1988_s6] ss:$0 sm:$0xff]  ;;  %p1392_p7 = scmp.ne.s32.totalorder %s1821_s13, %s1391_s16  ;;  %p2036_p8 = scmp.ne.s32.totalorder %s2020_s23, 0 }
  0x6a   : > { %627 = vmatprep.subr.bf16.mxu0 %v1279_v22  ;;  %s1572_s21 = smov [#allocation9]  }
  0x6b   : > { %p1393_p9 = pnand %p1392_p7, %p2036_p8 }
  0x6c   : > { %s1819_s27 = scalar_lea.hbm %s2034_s11, %s1808_s20 }
  0x6d   : > { %628 = vmatpush1.bf16.msra.mxu0 %v1281_v23  ;;  %s1834_s18 = scalar_lea.hbm %s2035_s24, %s1808_s20  ;;  %p1394_p12 = pneg %p1393_p9 }
  0x6e   : > { %629 = vmatprep.subr.bf16.mxu0 %v1282_v24 }
  0x71   : > { %630 = vmatpush1.bf16.msra.mxu0 %v1284_v26 }
  0x72   : > { %631 = vmatprep.subr.bf16.mxu0 %v1285_v27  ;;  %v1570_v27 = vmov 0.0  }
  0x75   : > { %632 = vmatpush1.bf16.msra.mxu0 %v1287_v28 }
  0x76   : > { %633 = vmatprep.subr.bf16.mxu0 %v1288_v29 }
  0x79   : > { %634 = vmatpush1.bf16.msra.mxu0 %v1290_v30 }
  0xe4   : > { %v468_v6 = vpop.xlane.xlu0 %467 }
  0xe5   : > { %v471_v7 = vmul.f32 0.03125, %v468_v6 }
  0xe7   : > { %v473_v8 = vsub.f32 %v463_v0, %v471_v7 }
  0xe8   : > { %v470_v9 = vpop.xlane.xlu0 %469 }
  0xe9   : > { %v472_v10 = vmul.f32 0.03125, %v470_v9  ;;  %v478_v11 = vsel %vm477_vm0, %v473_v8, 0.0 }
  0xea   : > { %v480_v12 = vmul.f32 %v478_v11, %v478_v11 }
  0xeb   : > { %v474_v13 = vsub.f32 %v464_v1, %v472_v10 }
  0xec   : > { %482 = vadd.xlane.f32.xlu1 %v480_v12  ;;  %v1114_v12 = vld [vmem:[%s1987_s5] ss:$0 sm:$0xff] }
  0xed   : > { %v479_v14 = vsel %vm477_vm0, %v474_v13, 0.0 }
  0xee   : > { %v481_v15 = vmul.f32 %v479_v14, %v479_v14 }
  0xf0   : > { %484 = vadd.xlane.f32.xlu1 %v481_v15 }
 0x175   : > { %v483_v31 = vpop.xlane.xlu1 %482 }
 0x176   : > { %v486_v32 = vmul.f32 0.03125, %v483_v31 }
 0x178   : > { %v488_v33 = vadd.f32 1e-05, %v486_v32 }
 0x179   : > { %v485_v34 = vpop.xlane.xlu1 %484 }
 0x17a   : > { %1291 = vrsqrt.f32 %v488_v33  ;;  %v487_v35 = vmul.f32 0.03125, %v485_v34 }
 0x17c   : > { %v489_v36 = vadd.f32 1e-05, %v487_v35 }
 0x17e   : > { %1293 = vrsqrt.f32 %v489_v36 }
 0x187   : > { %v1292_v37 = vpop.eup %1291 }
 0x188   : > { %v492_v38 = vmul.f32 %v1292_v37, %v473_v8 }
 0x18a   : > { %v500_v42 = vmul.f32 %v1092_v39, %v492_v38 }
 0x18b   : > { %v1294_v40 = vpop.eup %1293 }
 0x18c   : > { %v493_v41 = vmul.f32 %v1294_v40, %v474_v13  ;;  %v508_v45 = vadd.f32 %v1093_v43, %v500_v42  ;;  %v1116_v13 = vld [vmem:[%s1987_s5 + $0x1] ss:$0 sm:$0xff] }
 0x18e   : > { %v501_v44 = vmul.f32 %v1092_v39, %v493_v41 }
 0x190   : > { %v509_v46 = vadd.f32 %v1093_v43, %v501_v44 }
 0x192   : > { %v510_v47 = vpack.c.bf16 %v509_v46, %v508_v45 }
 0x194   : > { %652 = vmatmul.mubr.bf16.vlgmr.msra.gmra.mxu0 %v510_v47 }
 0x254   : > { %v653_v55 = vpop.f32.mrf.mxu0 }
 0x255   : > { %v654_v56 = vadd.f32 %v653_v55, %v532_v53 }
 0x256   : > { %v655_v57 = vpop.f32.mrf.mxu0 }
 0x257   : > { %v1110_v58 = vmul.f32 -1.442695, %v654_v56  ;;  %v656_v59 = vadd.f32 %v655_v57, %v536_v54 }
 0x258   : > { %v657_v60 = vpop.f32.mrf.mxu0 }
 0x259   : > { %1295 = vpow2.f32 %v1110_v58  ;;  %v1111_v61 = vmul.f32 -1.442695, %v656_v59  ;;  %v658_v62 = vadd.f32 %v657_v60, %v532_v53 }
 0x25a   : > { %v659_v63 = vpop.f32.mrf.mxu0 }
 0x25b   : > { %1297 = vpow2.f32 %v1111_v61  ;;  %v1112_v0 = vmul.f32 -1.442695, %v658_v62  ;;  %v660_v1 = vadd.f32 %v659_v63, %v536_v54 }
 0x25d   : > { %1299 = vpow2.f32 %v1112_v0  ;;  %v1113_v2 = vmul.f32 -1.442695, %v660_v1 }
 0x25f   : > { %1301 = vpow2.f32 %v1113_v2 }
 0x266   : > { %v1296_v3 = vpop.eup %1295 }
 0x267   : > { %v674_v4 = vadd.f32 1.0, %v1296_v3 }
 0x268   : > { %v1298_v5 = vpop.eup %1297 }
 0x269   : > { %1303 = vrcp.f32 %v674_v4  ;;  %v675_v6 = vadd.f32 1.0, %v1298_v5 }
 0x26a   : > { %v1300_v7 = vpop.eup %1299 }
 0x26b   : > { %1305 = vrcp.f32 %v675_v6  ;;  %v676_v8 = vadd.f32 1.0, %v1300_v7 }
 0x26c   : > { %v1302_v9 = vpop.eup %1301 }
 0x26d   : > { %1307 = vrcp.f32 %v676_v8  ;;  %v677_v10 = vadd.f32 1.0, %v1302_v9 }
 0x26f   : > { %1309 = vrcp.f32 %v677_v10 }
 0x276   : > { %v1304_v11 = vpop.eup %1303 }
 0x277   : > { %v686_v14 = vmul.f32 %v1304_v11, %v654_v56 }
 0x278   : > { %v1306_v15 = vpop.eup %1305 }
 0x279   : > { %v695_v17 = vmul.f32 %v1114_v12, %v686_v14  ;;  %v711_v18 = vmul.f32 %v1116_v13, %v686_v14  ;;  %v687_v19 = vmul.f32 %v1306_v15, %v656_v59 }
 0x27a   : > { %v1308_v20 = vpop.eup %1307 }
 0x27b   : > { %v718_v22 = vadd.f32 %v1117_v16, %v711_v18  ;;  %v1145_v23 = vpack.c.bf16 %v687_v19, %v687_v19  ;;  %v688_v24 = vmul.f32 %v1308_v20, %v658_v62  ;;  %v702_v26 = vadd.f32 %v1115_v21, %v695_v17 }
 0x27c   : > { %v1310_v25 = vpop.eup %1309 }
 0x27d   : > { %v1160_v28 = vpack.c.bf16 %v1570_v27, %v718_v22  ;;  %v696_v29 = vmul.f32 %v1114_v12, %v688_v24  ;;  %v689_v30 = vmul.f32 %v1310_v25, %v660_v1  ;;  %774 = vrot.lane.b32.xlu0 %v1145_v23, %s2007_s19  ;;  %766 = vst.msk [vmem:[%s1786_s25] sm:$0xf] %vm765_vm1, %v1145_v23  ;;  %s1395_s19 = sshll.u32 %s1572_s21, 4  ;;  %s1396_s19 = int_to_ptr.vmem [resolvable:$false] %s1395_s19 }
 0x27e   : > { %p1398_p13 = scmp.lt.s32.totalorder %s1821_s13, %s1396_s19 }
 0x27f   : > { %v703_v31 = vadd.f32 %v1115_v21, %v696_v29  ;;  %v1148_v32 = vpack.c.bf16 %v689_v30, %v689_v30  ;;  %1161 = vst [vmem:[%s442_s9] sm:$0xff] %v1160_v28   ;;  %s1397_s9 = scalar_lea.vmem %s1396_s19, 256 }
 0x280   : > { %p1399_p4 = scmp.lt.s32.totalorder %s1397_s9, %s1391_s16 }
 0x282   : > { %p1400_p2 = por %p1399_p4, %p1398_p13 }
 0x284   : > { %p1401_p6 = pnand %p1400_p2, %p1394_p12 }
 0x286   : > { %1404 = shalt.err (!%p1401_p6)
}
 0x287   : > { %s1405_s7 = scalar_lea.hbm %s1819_s27, 128  ;;  %s1409_s21 = scalar_lea.hbm %s2034_s11, 256 }
 0x288   : > { %p1406_p11 = scmp.ne.s32.totalorder %s1819_s27, %s1405_s7  ;;  %p1410_p10 = scmp.lt.s32.totalorder %s1819_s27, %s2034_s11 }
 0x289   : > { %p1411_p5 = scmp.lt.s32.totalorder %s1409_s21, %s1405_s7 }
 0x28a   : > { %p1407_p1 = pnand %p1406_p11, %p2036_p8 }
 0x28b   : > { %p1412_p3 = por %p1411_p5, %p1410_p10 }
 0x28c   : > { %p1408_p0 = pneg %p1407_p1 }
 0x28e   : > { %p1413_p7 = pnand %p1412_p3, %p1408_p0 }
 0x290   : > { %1416 = shalt.err (!%p1413_p7)
}
 0x291   : > { %s1573_s19 = smov 4   ;;  %s2037_s16 = smov 64   ;;  %v704_v33 = vmul.f32 0.125, %v702_v26  ;;  %v705_v34 = vmul.f32 0.125, %v703_v31 }
 0x292   : > { %1173 = dma.vmem_to_hbm [thread:$0]  (%p2036_p8), %s1821_s13, 128, %s1819_s27, %s1836_s28, %s2037_s16, %s2037_s16, %s1573_s19  }
 0x293   : > { %776 = vrot.lane.b32.xlu1 %v1148_v32, %s2037_s16  ;;  %s1417_s0 = scalar_lea.vmem %s1823_s12, 128  ;;  %s1574_s30 = smov [#allocation11]  }
 0x294   : > { %p1418_p9 = scmp.ne.s32.totalorder %s1823_s12, %s1417_s0  ;;  %s1421_s9 = sshll.u32 %s1574_s30, 4  ;;  %s1422_s9 = int_to_ptr.vmem [resolvable:$false] %s1421_s9 }
 0x295   : > { %s1423_s7 = scalar_lea.vmem %s1422_s9, 256  ;;  %p1424_p4 = scmp.lt.s32.totalorder %s1823_s12, %s1422_s9 }
 0x296   : > { %p1419_p12 = pnand %p1418_p9, %p2036_p8  ;;  %p1425_p2 = scmp.lt.s32.totalorder %s1423_s7, %s1417_s0 }
 0x298   : > { %p1420_p13 = pneg %p1419_p12  ;;  %p1426_p6 = por %p1425_p2, %p1424_p4 }
 0x29a   : > { %p1427_p11 = pnand %p1426_p6, %p1420_p13 }
 0x29c   : > { %1430 = shalt.err (!%p1427_p11)
}
 0x29d   : > { %s1431_s13 = scalar_lea.hbm %s1834_s18, 128  ;;  %s1435_s2 = scalar_lea.hbm %s2035_s24, 256 }
 0x29e   : > { %p1432_p1 = scmp.ne.s32.totalorder %s1834_s18, %s1431_s13  ;;  %p1436_p5 = scmp.lt.s32.totalorder %s1834_s18, %s2035_s24 }
 0x29f   : > { %p1437_p3 = scmp.lt.s32.totalorder %s1435_s2, %s1431_s13 }
 0x2a0   : > { %p1433_p0 = pnand %p1432_p1, %p2036_p8 }
 0x2a1   : > { %p1438_p7 = por %p1437_p3, %p1436_p5 }
 0x2a2   : > { %p1434_p10 = pneg %p1433_p0 }
 0x2a4   : > { %p1439_p9 = pnand %p1438_p7, %p1434_p10 }
 0x2a6   : > { %1442 = shalt.err (!%p1439_p9)
}
 0x2a7   : > { %1174 = dma.vmem_to_hbm [thread:$0]  (%p2036_p8), %s1823_s12, 128, %s1834_s18, %s1836_s28, %s2037_s16, %s2037_s16, %s1573_s19   ;;  %v1156_v35 = vpack.c.bf16 %v705_v34, %v704_v33 }
 0x2a8   : > { %s2038_s7 = sld [smem:[#allocation24_spill]]  ;;  %s2039_s27 = scalar_lea.vmem [#allocation8], %s1783_s22 }
 0x2a9   : > { %1157 = vst [vmem:[%s2039_s27] sm:$0xff] %v1156_v35   ;;  %s783_s25 = scalar_lea.sflag [#allocation4], %s1766_s10  ;;  %s1443_s2 = scalar_lea.vmem %s1894_s26, 128 }
 0x2aa   : > { %p1444_p12 = scmp.ne.s32.totalorder %s1894_s26, %s1443_s2  ;;  %s1575_s12 = smov [#allocation8]  }
 0x2ab   : > { %s1447_s18 = sshll.u32 %s1575_s12, 4  ;;  %s1448_s18 = int_to_ptr.vmem [resolvable:$false] %s1447_s18 }
 0x2ac   : > { %p1445_p13 = pnand %p1444_p12, %p2036_p8  ;;  %s1449_s28 = scalar_lea.vmem %s1448_s18, 256 }
 0x2ad   : > { %p1450_p2 = scmp.lt.s32.totalorder %s1894_s26, %s1448_s18  ;;  %p1451_p6 = scmp.lt.s32.totalorder %s1449_s28, %s1443_s2 }
 0x2ae   : > { %s1891_s13 = scalar_lea.hbm %s2038_s7, %s1808_s20  ;;  %p1446_p4 = pneg %p1445_p13 }
 0x2af   : > { %p1452_p11 = por %p1451_p6, %p1450_p2 }
 0x2b1   : > { %p1453_p1 = pnand %p1452_p11, %p1446_p4 }
 0x2b3   : > { %1456 = shalt.err (!%p1453_p1)
}
 0x2b4   : > { %s1457_s21 = scalar_lea.hbm %s1891_s13, 128  ;;  %s1461_s9 = scalar_lea.hbm %s2038_s7, 256 }
 0x2b5   : > { %p1458_p0 = scmp.ne.s32.totalorder %s1891_s13, %s1457_s21  ;;  %p1462_p3 = scmp.lt.s32.totalorder %s1891_s13, %s2038_s7 }
 0x2b6   : > { %p1463_p7 = scmp.lt.s32.totalorder %s1461_s9, %s1457_s21 }
 0x2b7   : > { %p1459_p10 = pnand %p1458_p0, %p2036_p8 }
 0x2b8   : > { %p1464_p9 = por %p1463_p7, %p1462_p3 }
 0x2b9   : > { %p1460_p5 = pneg %p1459_p10 }
 0x2bb   : > { %p1465_p12 = pnand %p1464_p9, %p1460_p5 }
 0x2bd   : > { %1468 = shalt.err (!%p1465_p12)
}
 0x2be   : > { %1172 = dma.vmem_to_hbm [thread:$0]  (%p2036_p8), %s1894_s26, 128, %s1891_s13, %s783_s25, %s2037_s16, %s2037_s16, %s1573_s19  }
 0x2bf   : > { %s456_s2 = scalar_lea.vmem [#allocation12], %s1783_s22  ;;  %s2040_s30 = sld [smem:[#allocation27_spill]] }
 0x2c0   : > { %s867_s18 = sshll.u32 %s456_s2, 4  ;;  %s798_s9 = scalar_lea.sflag [#allocation13], %s1766_s10  ;;  %s1924_s18 = int_to_ptr.vmem [resolvable:$true] %s867_s18 }
 0x2c1   : > { %s1469_s26 = scalar_lea.vmem %s1924_s18, 128  ;;  %s1576_s22 = smov [#allocation12]  }
 0x2c2   : > { %p1470_p13 = scmp.ne.s32.totalorder %s1924_s18, %s1469_s26  ;;  %s1473_s13 = sshll.u32 %s1576_s22, 4  ;;  %s1474_s13 = int_to_ptr.vmem [resolvable:$false] %s1473_s13 }
 0x2c3   : > { %s1475_s25 = scalar_lea.vmem %s1474_s13, 256  ;;  %p1476_p6 = scmp.lt.s32.totalorder %s1924_s18, %s1474_s13 }
 0x2c4   : > { %p1471_p4 = pnand %p1470_p13, %p2036_p8  ;;  %p1477_p11 = scmp.lt.s32.totalorder %s1475_s25, %s1469_s26 }
 0x2c5   : > { %s1930_s0 = scalar_lea.hbm %s2040_s30, %s1808_s20 }
 0x2c6   : > { %p1472_p2 = pneg %p1471_p4  ;;  %p1478_p1 = por %p1477_p11, %p1476_p6 }
 0x2c8   : > { %p1479_p0 = pnand %p1478_p1, %p1472_p2 }
 0x2ef   : > { %v775_v36 = vpop.permute.xlu0 %774 }
 0x2f0   : > { %780 = vst.msk [vmem:[%s456_s2] sm:$0xf] %vm765_vm1, %v775_v36 }
 0x305   : > { %v777_v37 = vpop.permute.xlu1 %776 }
 0x306   : > { %781 = vst.msk [vmem:[%s456_s2 + $0x4] sm:$0xf] %vm765_vm1, %v777_v37 }
 0x307   : > { %1482 = shalt.err (!%p1479_p0)
}
 0x308   : > { %s1483_s20 = scalar_lea.hbm %s1930_s0, 128  ;;  %s1487_s12 = scalar_lea.hbm %s2040_s30, 256 }
 0x309   : > { %p1484_p10 = scmp.ne.s32.totalorder %s1930_s0, %s1483_s20  ;;  %p1488_p7 = scmp.lt.s32.totalorder %s1930_s0, %s2040_s30 }
 0x30a   : > { %p1489_p9 = scmp.lt.s32.totalorder %s1487_s12, %s1483_s20 }
 0x30b   : > { %p1485_p5 = pnand %p1484_p10, %p2036_p8 }
 0x30c   : > { %p1490_p12 = por %p1489_p9, %p1488_p7 }
 0x30d   : > { %p1486_p3 = pneg %p1485_p5 }
 0x30f   : > { %p1491_p13 = pnand %p1490_p12, %p1486_p3 }
 0x311   : > { %1494 = shalt.err (!%p1491_p13)
}
 0x312   : > { %1175 = dma.vmem_to_hbm [thread:$0]  (%p2036_p8), %s1924_s18, 128, %s1930_s0, %s798_s9, %s2037_s16, %s2037_s16, %s1573_s19  }
 0x313 PF: > { %s2041_s21 = sld [smem:[#allocation19_spill]] }
 0x314   : > { %s2042_s26 = sld [smem:[#allocation21_spill]] }
 0x315   : > { %s2043_s22 = sld [smem:[#allocation20_spill]] }
 0x319   : > { %s882_s13 = sand.u32 1, %s2041_s21  }
 0x31a   : > { %p2044_p4 = scmp.ne.s32.totalorder %s2042_s26, 0  ;;  %s883_s25 = scalar_lea.sflag [#allocation4], %s882_s13 }
 0x31b   : > { %p2045_p2 = scmp.ge.s32.totalorder %s2043_s22, 2 }
 0x31d   : > { %p1192_p6 = pnand %p2045_p2, %p2044_p4 }
 0x31f   : > { %p1193_p11 = pneg %p1192_p6 }
 0x321   : > { %1528 = dma.done.wait (%p1193_p11), %s883_s25, 128  }
 0x322   : > { %1530 = vsyncadd (%p1193_p11), %s883_s25, 4294967168  ;;  %s2046_s23 = sadd.s32 4294967294, %s2043_s22  }
 0x323   : > { %s891_s20 = sand.u32 1, %s2046_s23  }
 0x324   : > { %s892_s10 = scalar_lea.sflag [#allocation10], %s891_s20 }
 0x325   : > { %1532 = dma.done.wait (%p1193_p11), %s892_s10, 256  }
 0x326   : > { %1534 = vsyncadd (%p1193_p11), %s892_s10, 4294967040  ;;  %s910_s27 = scalar_lea.sflag [#allocation13], %s882_s13 }
 0x327   : > { %1536 = dma.done.wait (%p1193_p11), %s910_s27, 128  }
 0x328   : > { %1538 = vsyncadd (%p1193_p11), %s910_s27, 4294967168  ;;  %s34_s18 = sadd.s32 1, %s2043_s22   ;;  %s2047_s13 = smov %s1545_s14 }
 0x329   : > { %p31_p8 = scmp.ge.s32.totalorder %s34_s18, 4   ;;  %s2048_s14 = smov %s1549_s15 }
 0x32a   : > { %s2049_s15 = smov %s1761_s8  ;;  %s2050_s16 = smov %s1557_s17 }
 0x32b   : > { %s2051_s17 = smov %s2053_s29  ;;  %33 = sbr.rel (!%p31_p8) target bundleno = 18 (0x12), region = 150 }
 0x330   :  { %915 = vsyncpa [#allocation3], 1 }
 0x331   :  { %917 = vsyncpa [#allocation3 + $0x1], 1 }
 0x332   :  { %918 = vsyncpa [#allocation6], 1 }
 0x333   :  { %919 = vsyncpa [#allocation4], 1 }
 0x334   :  { %921 = vsyncpa [#allocation4 + $0x1], 1 }
 0x335   :  { %922 = vsyncpa [#allocation10], 1 }
 0x336   :  { %924 = vsyncpa [#allocation10 + $0x1], 1 }
 0x337   :  { %925 = vsyncpa [#allocation13], 1 }
 0x338   :  { %927 = vsyncpa [#allocation13 + $0x1], 1 }

// kernel: tpu_custom_call.1
= control target key start
LH: loop header
LB: loop body
LE: loop exit
PB: predicated region body
PF: predicated region fallthrough
CT: control target
= control target key end

     0   :  { %s1982_s0 = inlined_call_operand.hbm [shape: f32[2,16,128], index: 0, kind: input, shape index: {}]   ;;  %s1983_s1 = inlined_call_operand.vmem [shape: f32[1,128], index: 1, kind: input, shape index: {}]   ;;  %s1984_s2 = inlined_call_operand.hbm [shape: f32[1,128], index: 2, kind: input, shape index: {}]   ;;  %s1985_s3 = inlined_call_operand.hbm [shape: bf16[128,256], index: 3, kind: input, shape index: {}]   ;;  %s1986_s4 = inlined_call_operand.vmem [shape: f32[1,256], index: 4, kind: input, shape index: {}]   ;;  %s1987_s5 = inlined_call_operand.vmem [shape: f32[2,128], index: 5, kind: input, shape index: {}]   ;;  %s1988_s6 = inlined_call_operand.vmem [shape: f32[2,128], index: 6, kind: input, shape index: {}]   ;;  %s1989_s7 = inlined_call_operand.hbm [shape: bf16[2,16,128], index: 7, kind: output, shape index: {0}]   ;;  %s1990_s8 = inlined_call_operand.hbm [shape: bf16[2,16,128], index: 8, kind: output, shape index: {1}]   ;;  %s1991_s9 = inlined_call_operand.hbm [shape: bf16[2,16,64], index: 9, kind: output, shape index: {2}]   ;;  %s1992_s10 = inlined_call_operand.hbm [shape: bf16[2,16,64], index: 10, kind: output, shape index: {3}]  }
   0x1   :  { %2010 = sst [smem:[#allocation22_spill]] %s1982_s0 }
   0x2   :  { %2011 = sst [smem:[#allocation23_spill]] %s1984_s2 }
   0x3   :  { %2012 = sst [smem:[#allocation24_spill]] %s1989_s7 }
   0x4   :  { %2013 = sst [smem:[#allocation25_spill]] %s1990_s8 }
   0x5   :  { %2014 = sst [smem:[#allocation26_spill]] %s1991_s9 }
   0x6   :  { %2015 = sst [smem:[#allocation27_spill]] %s1992_s10 }
   0x7   :  { %16 = vsyncpa [#allocation3], 0 }
   0x8   :  { %18 = vsyncpa [#allocation3 + $0x1], 0 }
   0x9   :  { %19 = vsyncpa [#allocation6], 0 }
   0xa   :  { %20 = vsyncpa [#allocation4], 0 }
   0xb   :  { %22 = vsyncpa [#allocation4 + $0x1], 0 }
   0xc   :  { %23 = vsyncpa [#allocation10], 0 }
   0xd   :  { %25 = vsyncpa [#allocation10 + $0x1], 0 }
   0xe   :  { %26 = vsyncpa [#allocation13], 0 }
   0xf   :  { %28 = vsyncpa [#allocation13 + $0x1], 0  ;;  %s1632_s13 = smov 0   ;;  %s1634_s14 = smov 0  }
  0x10   :  { %s1636_s15 = smov 0   ;;  %s1638_s16 = smov 0  }
  0x11   :  { %s1640_s17 = smov 0   ;;  %s1642_s18 = smov 0  }
  0x12 LB: > { %2016 = sst [smem:[#allocation19_spill]] %s1541_s13  ;;  %s1663_s19 = sadd.s32 4294967295, %s1561_s18   ;;  %s1561_s18 = sphi %s1642_s18, %s34_s18   ;;  %s1557_s17 = sphi %s1640_s17, %s2051_s17   ;;  %s1553_s16 = sphi %s1638_s16, %s2050_s16   ;;  %s1549_s15 = sphi %s1636_s15, %s2049_s15   ;;  %s1545_s14 = sphi %s1634_s14, %s2048_s14   ;;  %s1541_s13 = sphi %s1632_s13, %s2047_s13  }
  0x13   : > { %2017 = sst [smem:[#allocation20_spill]] %s1561_s18  ;;  %s1994_s20 = sadd.s32 4294967294, %s1561_s18  }
  0x14   : > { %p62_p0 = scmp.ne.s32.totalorder %s1549_s15, %s1545_s14  ;;  %p63_p1 = scmp.eq.s32.totalorder %s1561_s18, 0 }
  0x15   : > { %p68_p2 = scmp.ne.s32.totalorder %s1545_s14, %s1541_s13  ;;  %p1995_p3 = scmp.eq.s32.totalorder %s1663_s19, 0 }
  0x16   : > { %p220_p4 = scmp.eq.s32.totalorder %s1663_s19, 1  ;;  %p1673_p5 = por %p63_p1, %p62_p0 }
  0x17   : > { %p226_p6 = scmp.eq.s32.totalorder %s1994_s20, 1  ;;  %p1681_p7 = por %p1995_p3, %p68_p2 }
  0x18   : > { %p1685_p8 = por %p220_p4, %p62_p0  ;;  %p1077_p10 = scmp.ge.s32.totalorder %s1561_s18, 1 }
  0x19   : > { %s2019_s22 = scalar_select %p1681_p7, 1, 0 }
  0x1a   : > { %s2020_s23 = scalar_select %p1685_p8, 1, 0 }
  0x1b   : > { %p1689_p9 = por %p226_p6, %p68_p2  ;;  %p317_p11 = scmp.lt.s32.totalorder %s1561_s18, 3 }
  0x1c   : > { %s1563_s26 = smov [#allocation5]   ;;  %p1206_p1 = scmp.lt.s32.totalorder %s1561_s18, 2 }
  0x1d   : > { %s2021_s24 = scalar_select %p1689_p9, 1, 0 }
  0x1e   : > { %p1696_p13 = pnand %p1077_p10, %p317_p11  ;;  %s333_s27 = sshll.u32 %s1563_s26, 4  ;;  %s334_s27 = int_to_ptr.vmem [resolvable:$true] %s333_s27 }
  0x1f   : > { %2022 = sst [smem:[#allocation21_spill]] %s2021_s24  ;;  %p1705_p4 = pnand %p1206_p1, %p1673_p5 }
  0x20   : > { %s2023_s25 = scalar_select %p1696_p13, 1, 0 }
  0x21   : > { %p1180_p0 = pneg %p1696_p13  ;;  %s1564_s29 = smov [#allocation7]  }
  0x22   : > { %s2024_s28 = scalar_select %p1705_p4, 1, 0 }
  0x23   : > { %s343_s30 = sshll.u32 %s1564_s29, 4  ;;  %p1711_p2 = pnand %p1180_p0, %p1995_p3  ;;  %s344_s30 = int_to_ptr.vmem [resolvable:$true] %s343_s30 }
  0x24   : > { %s1322_s12 = scalar_lea.vmem %s334_s27, 16  ;;  %s1329_s21 = scalar_lea.vmem %s334_s27, 32 }
  0x25   : > { %p1313_p6 = pneg %p1711_p2  ;;  %p1323_p10 = scmp.ne.s32.totalorder %s334_s27, %s1322_s12 }
  0x26   : > { %p1330_p1 = scmp.lt.s32.totalorder %s334_s27, %s334_s27  ;;  %p1331_p12 = scmp.lt.s32.totalorder %s1329_s21, %s1322_s12 }
  0x27   : > { %p1325_p5 = pnand %p1323_p10, %p1313_p6 }
  0x28   : > { %p1332_p9 = por %p1331_p12, %p1330_p1 }
  0x29   : > { %p1326_p11 = pneg %p1325_p5 }
  0x2b   : > { %p1333_p8 = pnand %p1332_p9, %p1326_p11 }
  0x2d   : > { %1336 = shalt.err (!%p1333_p8)
}
  0x2e   : > { %s2026_s2 = sld [smem:[#allocation23_spill]]  ;;  %s1348_s20 = scalar_lea.vmem %s344_s30, 2048 }
  0x2f   : > { %p1349_p0 = scmp.ne.s32.totalorder %s344_s30, %s1348_s20  ;;  %p1356_p5 = scmp.lt.s32.totalorder %s344_s30, %s344_s30 }
  0x30   : > { %p1357_p7 = scmp.lt.s32.totalorder %s1348_s20, %s1348_s20 }
  0x31   : > { %p1351_p3 = pnand %p1349_p0, %p1313_p6 }
  0x32   : > { %p1358_p13 = por %p1357_p7, %p1356_p5 }
  0x33   : > { %p1352_p10 = pneg %p1351_p3 }
  0x34   : > { %1183 = dma.hbm_to_vmem [thread:$0]  (!%p1711_p2), %s2026_s2, 16, %s334_s27, [#allocation6]  }
  0x35   : > { %p1359_p4 = pnand %p1358_p13, %p1352_p10 }
  0x37   : > { %1362 = shalt.err (!%p1359_p4)
}
  0x38   : > { %s1565_s12 = smov 128   ;;  %s1566_s21 = smov 8  }
  0x39   : > { %1186 = dma.hbm_to_vmem [thread:$0]  (!%p1711_p2), %s1985_s3, 2048, %s344_s30, [#allocation6], %s1565_s12, %s1565_s12, %s1566_s21  }
  0x3a   : > { %s366_s20 = sand.u32 1, %s1549_s15   ;;  %s46_s29 = sadd.s32 1, %s1557_s17 }
  0x3b   : > { %s1081_s2 = sshll.u32 %s366_s20, 4  ;;  %p48_p3 = scmp.ge.s32.totalorder %s46_s29, 2 }
  0x3c   : > { %s1140_s18 = sshll.u32 %s1557_s17, 8  ;;  %s370_s24 = scalar_lea.vmem [#allocation2], %s1081_s2 }
  0x3d   : > { %s379_s13 = sshll.u32 %s370_s24, 4  ;;  %s2053_s29 = smov (%p48_p3, %s46_s29), 0  ;;  %s380_s13 = int_to_ptr.vmem [resolvable:$true] %s379_s13 }
  0x3e   : > { %s2027_s0 = sld [smem:[#allocation22_spill]]  ;;  %s55_s9 = sadd.s32 1, %s1549_s15 }
  0x3f   : > { %s50_s8 = ssub.s32 %s1557_s17, %s2053_s29  ;;  %s367_s30 = scalar_lea.sflag [#allocation3], %s366_s20 }
  0x40   : > { %p1747_p7 = scmp.eq.s32.totalorder %s50_s8, 0  ;;  %p2029_p8 = scmp.ne.s32.totalorder %s2024_s28, 0 }
  0x41   : > { %s1376_s26 = scalar_lea.vmem %s380_s13, 256  ;;  %s1567_s2 = smov [#allocation2]  }
  0x42   : > { %p1365_p9 = pneg %p2029_p8  ;;  %p1377_p12 = scmp.ne.s32.totalorder %s380_s13, %s1376_s26 }
  0x43   : > { %s1381_s24 = sshll.u32 %s1567_s2, 4  ;;  %s1382_s24 = int_to_ptr.vmem [resolvable:$false] %s1381_s24 }
  0x44   : > { %s378_s11 = scalar_lea.hbm %s2027_s0, %s1140_s18  ;;  %p1379_p13 = pnand %p1377_p12, %p1365_p9 }
  0x45   : > { %s1383_s7 = scalar_lea.vmem %s1382_s24, 512  ;;  %p1384_p2 = scmp.lt.s32.totalorder %s380_s13, %s1382_s24 }
  0x46   : > { %p1380_p4 = pneg %p1379_p13  ;;  %p1385_p6 = scmp.lt.s32.totalorder %s1383_s7, %s1376_s26 }
  0x48   : > { %p1386_p11 = por %p1385_p6, %p1384_p2 }
  0x4a   : > { %p1387_p1 = pnand %p1386_p11, %p1380_p4 }
  0x4c   : > { %1390 = shalt.err (!%p1387_p1)
}
  0x4d   : > { %1190 = dma.hbm_to_vmem [thread:$0]  (!%p2029_p8), %s378_s11, 256, %s380_s13, %s367_s30, %s1565_s12, %s1565_s12, %s1566_s21  }
  0x4e   : > { %s1761_s8 = scalar_select %p1747_p7, %s1549_s15, %s55_s9  }
  0x4f   : > { %p2030_p0 = scmp.ne.s32.totalorder %s2023_s25, 0 }
  0x50   : > { %s1766_s10 = sand.u32 (!%p2030_p0), 1, %s1545_s14   ;;  %p2031_p10 = scmp.ne.s32.totalorder (!%p2030_p0), %s2019_s22, 0 }
  0x51   : > { %391 = sbr.rel (%p2030_p0) target bundleno = 787 (0x313), region = 48  ;;  %s1085_s18 = sshll.u32 (!%p2030_p0), %s1766_s10, 4 }
  0x52   : > { %s394_s28 = scalar_lea.sflag (!%p2030_p0), [#allocation3], %s1766_s10  ;;  %s397_s20 = scalar_lea.vmem (!%p2030_p0), [#allocation2], %s1085_s18 }
  0x56   : > { %1520 = dma.done.wait (%p2031_p10), %s394_s28, 256  }
  0x57   : > { %1522 = vsyncadd (%p2031_p10), %s394_s28, 4294967040  ;;  %p2032_p5 = scmp.eq.s32.totalorder %s1663_s19, 0 }
  0x59   : > { %1524 = dma.done.wait (%p2032_p5), [#allocation6], 2064   ;;  %p2033_p3 = pmov %p2032_p5 }
  0x5a   : > { %v463_v0 = vld [vmem:[%s397_s20] sm:$0xff]  ;;  %v464_v1 = vld [vmem:[%s397_s20 + $0x8] sm:$0xff]  ;;  %v475_v4 = vlaneseq  ;;  %v1568_v25 = vmov 0   ;;  %s1783_s22 = sshll.u32 %s1766_s10, 3  ;;  %vm765_vm1 = vcmask 519168   ;;  %v1569_v48 = vmov 0.0|0.0  }
  0x5b   : > { %1526 = vsyncadd (%p2033_p3), [#allocation6], 4294965232  ;;  %467 = vadd.xlane.f32.xlu0 %v463_v0  ;;  %v1267_v2 = vld [vmem:[#allocation7 + $0x74] ss:$8 sps:$4 sm:$0xff]   ;;  %v1269_v3 = vld [vmem:[#allocation7 + $0x70] ss:$8 sps:$4 sm:$0xff]   ;;  %651 = vmatprep.mubr.bf16.mxu0 %v1568_v25 }
  0x5c   : > { %619 = vmatprep.subr.bf16.mxu0 %v1267_v2  ;;  %v476_v5 = vand.u32 127, %v475_v4  ;;  %v1270_v16 = vld [vmem:[#allocation7 + $0x64] ss:$8 sps:$4 sm:$0xff]   ;;  %v1272_v17 = vld [vmem:[#allocation7 + $0x60] ss:$8 sps:$4 sm:$0xff]   ;;  %s1786_s25 = scalar_lea.vmem [#allocation11], %s1783_s22 }
  0x5d   : > { %620 = vmatpush1.bf16.msra.mxu0 %v1269_v3  ;;  %v1273_v18 = vld [vmem:[#allocation7 + $0x54] ss:$8 sps:$4 sm:$0xff]   ;;  %v1275_v19 = vld [vmem:[#allocation7 + $0x50] ss:$8 sps:$4 sm:$0xff]   ;;  %v1276_v20 = vld [vmem:[#allocation7 + $0x44] ss:$8 sps:$4 sm:$0xff]  }
  0x5e   : > { %vm477_vm0 = vcmp.lt.s32.totalorder %v476_v5, 32  ;;  %621 = vmatprep.subr.bf16.mxu0 %v1270_v16  ;;  %v1278_v21 = vld [vmem:[#allocation7 + $0x40] ss:$8 sps:$4 sm:$0xff]   ;;  %v1279_v22 = vld [vmem:[#allocation7 + $0x34] ss:$8 sps:$4 sm:$0xff]   ;;  %v530_v49 = vshrl.u32 %v475_v4, 7 }
  0x5f   : > { %469 = vadd.xlane.f32.xlu0 %v464_v1  ;;  %v1281_v23 = vld [vmem:[#allocation7 + $0x30] ss:$8 sps:$4 sm:$0xff]   ;;  %v1282_v24 = vld [vmem:[#allocation7 + $0x24] ss:$8 sps:$4 sm:$0xff]   ;;  %v1284_v26 = vld [vmem:[#allocation7 + $0x20] ss:$8 sps:$4 sm:$0xff]  }
  0x60   : > { %v1285_v27 = vld [vmem:[#allocation7 + $0x14] ss:$8 sps:$4 sm:$0xff]   ;;  %v1287_v28 = vld [vmem:[#allocation7 + $0x10] ss:$8 sps:$4 sm:$0xff]   ;;  %v1288_v29 = vld [vmem:[#allocation7 + $0x4] ss:$8 sps:$4 sm:$0xff]  }
  0x61   : > { %622 = vmatpush1.bf16.msra.mxu0 %v1272_v17  ;;  %v1290_v30 = vld [vmem:[#allocation7] ss:$8 sps:$4 sm:$0xff]   ;;  %v1092_v39 = vld [vmem:[%s1983_s1] ss:$0 sm:$0xff]  ;;  %767 = vst.msk [vmem:[%s1786_s25 + $0x4] sm:$0xf] %vm765_vm1, %v1569_v48 }
  0x62   : > { %623 = vmatprep.subr.bf16.mxu0 %v1273_v18  ;;  %v1093_v43 = vld [vmem:[#allocation5] ss:$0 sm:$0xff]  ;;  %v531_v50 = vsub.s32 0, %v530_v49  ;;  %v535_v52 = vsub.s32 1, %v530_v49  ;;  %v1117_v16 = vld [vmem:[%s1988_s6 + $0x1] ss:$0 sm:$0xff] }
  0x63   : > { %v527_v51 = vld [vmem:[%s1986_s4] sm:$0x3]  ;;  %s787_s7 = sand.u32 1, %s1663_s19   ;;  %s1808_s20 = sshll.u32 %s1553_s16, 7 }
  0x64   : > { %v532_v53 = vrot.slane %v527_v51, %v531_v50  ;;  %v536_v54 = vrot.slane %v527_v51, %v535_v52  ;;  %s442_s9 = scalar_lea.vmem [#allocation9], %s1783_s22  ;;  %s849_s12 = sshll.u32 %s1786_s25, 4  ;;  %s1823_s12 = int_to_ptr.vmem [resolvable:$true] %s849_s12 }
  0x65   : > { %624 = vmatpush1.bf16.msra.mxu0 %v1275_v19  ;;  %s831_s13 = sshll.u32 %s442_s9, 4  ;;  %s2007_s19 = smov 64   ;;  %s1821_s13 = int_to_ptr.vmem [resolvable:$true] %s831_s13 }
  0x66   : > { %625 = vmatprep.subr.bf16.mxu0 %v1276_v20  ;;  %s2034_s11 = sld [smem:[#allocation25_spill]]  ;;  %s2009_s30 = scalar_lea.vmem [#allocation8], %s1783_s22 }
  0x67   : > { %s1828_s26 = sshll.u32 %s2009_s30, 4  ;;  %s2035_s24 = sld [smem:[#allocation26_spill]]  ;;  %s1894_s26 = int_to_ptr.vmem [resolvable:$true] %s1828_s26 }
  0x68   : > { %s1836_s28 = scalar_lea.sflag [#allocation10], %s787_s7  ;;  %s1391_s16 = scalar_lea.vmem %s1821_s13, 128 }
  0x69   : > { %626 = vmatpush1.bf16.msra.mxu0 %v1278_v21  ;;  %v1115_v21 = vld [vmem:[%s1988_s6] ss:$0 sm:$0xff]  ;;  %p1392_p7 = scmp.ne.s32.totalorder %s1821_s13, %s1391_s16  ;;  %p2036_p8 = scmp.ne.s32.totalorder %s2020_s23, 0 }
  0x6a   : > { %627 = vmatprep.subr.bf16.mxu0 %v1279_v22  ;;  %s1572_s21 = smov [#allocation9]  }
  0x6b   : > { %p1393_p9 = pnand %p1392_p7, %p2036_p8 }
  0x6c   : > { %s1819_s27 = scalar_lea.hbm %s2034_s11, %s1808_s20 }
  0x6d   : > { %628 = vmatpush1.bf16.msra.mxu0 %v1281_v23  ;;  %s1834_s18 = scalar_lea.hbm %s2035_s24, %s1808_s20  ;;  %p1394_p12 = pneg %p1393_p9 }
  0x6e   : > { %629 = vmatprep.subr.bf16.mxu0 %v1282_v24 }
  0x71   : > { %630 = vmatpush1.bf16.msra.mxu0 %v1284_v26 }
  0x72   : > { %631 = vmatprep.subr.bf16.mxu0 %v1285_v27  ;;  %v1570_v27 = vmov 0.0  }
  0x75   : > { %632 = vmatpush1.bf16.msra.mxu0 %v1287_v28 }
  0x76   : > { %633 = vmatprep.subr.bf16.mxu0 %v1288_v29 }
  0x79   : > { %634 = vmatpush1.bf16.msra.mxu0 %v1290_v30 }
  0xe4   : > { %v468_v6 = vpop.xlane.xlu0 %467 }
  0xe5   : > { %v471_v7 = vmul.f32 0.03125, %v468_v6 }
  0xe7   : > { %v473_v8 = vsub.f32 %v463_v0, %v471_v7 }
  0xe8   : > { %v470_v9 = vpop.xlane.xlu0 %469 }
  0xe9   : > { %v472_v10 = vmul.f32 0.03125, %v470_v9  ;;  %v478_v11 = vsel %vm477_vm0, %v473_v8, 0.0 }
  0xea   : > { %v480_v12 = vmul.f32 %v478_v11, %v478_v11 }
  0xeb   : > { %v474_v13 = vsub.f32 %v464_v1, %v472_v10 }
  0xec   : > { %482 = vadd.xlane.f32.xlu1 %v480_v12  ;;  %v1114_v12 = vld [vmem:[%s1987_s5] ss:$0 sm:$0xff] }
  0xed   : > { %v479_v14 = vsel %vm477_vm0, %v474_v13, 0.0 }
  0xee   : > { %v481_v15 = vmul.f32 %v479_v14, %v479_v14 }
  0xf0   : > { %484 = vadd.xlane.f32.xlu1 %v481_v15 }
 0x175   : > { %v483_v31 = vpop.xlane.xlu1 %482 }
 0x176   : > { %v486_v32 = vmul.f32 0.03125, %v483_v31 }
 0x178   : > { %v488_v33 = vadd.f32 1e-05, %v486_v32 }
 0x179   : > { %v485_v34 = vpop.xlane.xlu1 %484 }
 0x17a   : > { %1291 = vrsqrt.f32 %v488_v33  ;;  %v487_v35 = vmul.f32 0.03125, %v485_v34 }
 0x17c   : > { %v489_v36 = vadd.f32 1e-05, %v487_v35 }
 0x17e   : > { %1293 = vrsqrt.f32 %v489_v36 }
 0x187   : > { %v1292_v37 = vpop.eup %1291 }
 0x188   : > { %v492_v38 = vmul.f32 %v1292_v37, %v473_v8 }
 0x18a   : > { %v500_v42 = vmul.f32 %v1092_v39, %v492_v38 }
 0x18b   : > { %v1294_v40 = vpop.eup %1293 }
 0x18c   : > { %v493_v41 = vmul.f32 %v1294_v40, %v474_v13  ;;  %v508_v45 = vadd.f32 %v1093_v43, %v500_v42  ;;  %v1116_v13 = vld [vmem:[%s1987_s5 + $0x1] ss:$0 sm:$0xff] }
 0x18e   : > { %v501_v44 = vmul.f32 %v1092_v39, %v493_v41 }
 0x190   : > { %v509_v46 = vadd.f32 %v1093_v43, %v501_v44 }
 0x192   : > { %v510_v47 = vpack.c.bf16 %v509_v46, %v508_v45 }
 0x194   : > { %652 = vmatmul.mubr.bf16.vlgmr.msra.gmra.mxu0 %v510_v47 }
 0x254   : > { %v653_v55 = vpop.f32.mrf.mxu0 }
 0x255   : > { %v654_v56 = vadd.f32 %v653_v55, %v532_v53 }
 0x256   : > { %v655_v57 = vpop.f32.mrf.mxu0 }
 0x257   : > { %v1110_v58 = vmul.f32 -1.442695, %v654_v56  ;;  %v656_v59 = vadd.f32 %v655_v57, %v536_v54 }
 0x258   : > { %v657_v60 = vpop.f32.mrf.mxu0 }
 0x259   : > { %1295 = vpow2.f32 %v1110_v58  ;;  %v1111_v61 = vmul.f32 -1.442695, %v656_v59  ;;  %v658_v62 = vadd.f32 %v657_v60, %v532_v53 }
 0x25a   : > { %v659_v63 = vpop.f32.mrf.mxu0 }
 0x25b   : > { %1297 = vpow2.f32 %v1111_v61  ;;  %v1112_v0 = vmul.f32 -1.442695, %v658_v62  ;;  %v660_v1 = vadd.f32 %v659_v63, %v536_v54 }
 0x25d   : > { %1299 = vpow2.f32 %v1112_v0  ;;  %v1113_v2 = vmul.f32 -1.442695, %v660_v1 }
 0x25f   : > { %1301 = vpow2.f32 %v1113_v2 }
 0x266   : > { %v1296_v3 = vpop.eup %1295 }
 0x267   : > { %v674_v4 = vadd.f32 1.0, %v1296_v3 }
 0x268   : > { %v1298_v5 = vpop.eup %1297 }
 0x269   : > { %1303 = vrcp.f32 %v674_v4  ;;  %v675_v6 = vadd.f32 1.0, %v1298_v5 }
 0x26a   : > { %v1300_v7 = vpop.eup %1299 }
 0x26b   : > { %1305 = vrcp.f32 %v675_v6  ;;  %v676_v8 = vadd.f32 1.0, %v1300_v7 }
 0x26c   : > { %v1302_v9 = vpop.eup %1301 }
 0x26d   : > { %1307 = vrcp.f32 %v676_v8  ;;  %v677_v10 = vadd.f32 1.0, %v1302_v9 }
 0x26f   : > { %1309 = vrcp.f32 %v677_v10 }
 0x276   : > { %v1304_v11 = vpop.eup %1303 }
 0x277   : > { %v686_v14 = vmul.f32 %v1304_v11, %v654_v56 }
 0x278   : > { %v1306_v15 = vpop.eup %1305 }
 0x279   : > { %v695_v17 = vmul.f32 %v1114_v12, %v686_v14  ;;  %v711_v18 = vmul.f32 %v1116_v13, %v686_v14  ;;  %v687_v19 = vmul.f32 %v1306_v15, %v656_v59 }
 0x27a   : > { %v1308_v20 = vpop.eup %1307 }
 0x27b   : > { %v718_v22 = vadd.f32 %v1117_v16, %v711_v18  ;;  %v1145_v23 = vpack.c.bf16 %v687_v19, %v687_v19  ;;  %v688_v24 = vmul.f32 %v1308_v20, %v658_v62  ;;  %v702_v26 = vadd.f32 %v1115_v21, %v695_v17 }
 0x27c   : > { %v1310_v25 = vpop.eup %1309 }
 0x27d   : > { %v1160_v28 = vpack.c.bf16 %v1570_v27, %v718_v22  ;;  %v696_v29 = vmul.f32 %v1114_v12, %v688_v24  ;;  %v689_v30 = vmul.f32 %v1310_v25, %v660_v1  ;;  %774 = vrot.lane.b32.xlu0 %v1145_v23, %s2007_s19  ;;  %766 = vst.msk [vmem:[%s1786_s25] sm:$0xf] %vm765_vm1, %v1145_v23  ;;  %s1395_s19 = sshll.u32 %s1572_s21, 4  ;;  %s1396_s19 = int_to_ptr.vmem [resolvable:$false] %s1395_s19 }
 0x27e   : > { %p1398_p13 = scmp.lt.s32.totalorder %s1821_s13, %s1396_s19 }
 0x27f   : > { %v703_v31 = vadd.f32 %v1115_v21, %v696_v29  ;;  %v1148_v32 = vpack.c.bf16 %v689_v30, %v689_v30  ;;  %1161 = vst [vmem:[%s442_s9] sm:$0xff] %v1160_v28   ;;  %s1397_s9 = scalar_lea.vmem %s1396_s19, 256 }
 0x280   : > { %p1399_p4 = scmp.lt.s32.totalorder %s1397_s9, %s1391_s16 }
 0x282   : > { %p1400_p2 = por %p1399_p4, %p1398_p13 }
 0x284   : > { %p1401_p6 = pnand %p1400_p2, %p1394_p12 }
 0x286   : > { %1404 = shalt.err (!%p1401_p6)
}
 0x287   : > { %s1405_s7 = scalar_lea.hbm %s1819_s27, 128  ;;  %s1409_s21 = scalar_lea.hbm %s2034_s11, 256 }
 0x288   : > { %p1406_p11 = scmp.ne.s32.totalorder %s1819_s27, %s1405_s7  ;;  %p1410_p10 = scmp.lt.s32.totalorder %s1819_s27, %s2034_s11 }
 0x289   : > { %p1411_p5 = scmp.lt.s32.totalorder %s1409_s21, %s1405_s7 }
 0x28a   : > { %p1407_p1 = pnand %p1406_p11, %p2036_p8 }
 0x28b   : > { %p1412_p3 = por %p1411_p5, %p1410_p10 }
 0x28c   : > { %p1408_p0 = pneg %p1407_p1 }
 0x28e   : > { %p1413_p7 = pnand %p1412_p3, %p1408_p0 }
 0x290   : > { %1416 = shalt.err (!%p1413_p7)
}
 0x291   : > { %s1573_s19 = smov 4   ;;  %s2037_s16 = smov 64   ;;  %v704_v33 = vmul.f32 0.125, %v702_v26  ;;  %v705_v34 = vmul.f32 0.125, %v703_v31 }
 0x292   : > { %1173 = dma.vmem_to_hbm [thread:$0]  (%p2036_p8), %s1821_s13, 128, %s1819_s27, %s1836_s28, %s2037_s16, %s2037_s16, %s1573_s19  }
 0x293   : > { %776 = vrot.lane.b32.xlu1 %v1148_v32, %s2037_s16  ;;  %s1417_s0 = scalar_lea.vmem %s1823_s12, 128  ;;  %s1574_s30 = smov [#allocation11]  }
 0x294   : > { %p1418_p9 = scmp.ne.s32.totalorder %s1823_s12, %s1417_s0  ;;  %s1421_s9 = sshll.u32 %s1574_s30, 4  ;;  %s1422_s9 = int_to_ptr.vmem [resolvable:$false] %s1421_s9 }
 0x295   : > { %s1423_s7 = scalar_lea.vmem %s1422_s9, 256  ;;  %p1424_p4 = scmp.lt.s32.totalorder %s1823_s12, %s1422_s9 }
 0x296   : > { %p1419_p12 = pnand %p1418_p9, %p2036_p8  ;;  %p1425_p2 = scmp.lt.s32.totalorder %s1423_s7, %s1417_s0 }
 0x298   : > { %p1420_p13 = pneg %p1419_p12  ;;  %p1426_p6 = por %p1425_p2, %p1424_p4 }
 0x29a   : > { %p1427_p11 = pnand %p1426_p6, %p1420_p13 }
 0x29c   : > { %1430 = shalt.err (!%p1427_p11)
}
 0x29d   : > { %s1431_s13 = scalar_lea.hbm %s1834_s18, 128  ;;  %s1435_s2 = scalar_lea.hbm %s2035_s24, 256 }
 0x29e   : > { %p1432_p1 = scmp.ne.s32.totalorder %s1834_s18, %s1431_s13  ;;  %p1436_p5 = scmp.lt.s32.totalorder %s1834_s18, %s2035_s24 }
 0x29f   : > { %p1437_p3 = scmp.lt.s32.totalorder %s1435_s2, %s1431_s13 }
 0x2a0   : > { %p1433_p0 = pnand %p1432_p1, %p2036_p8 }
 0x2a1   : > { %p1438_p7 = por %p1437_p3, %p1436_p5 }
 0x2a2   : > { %p1434_p10 = pneg %p1433_p0 }
 0x2a4   : > { %p1439_p9 = pnand %p1438_p7, %p1434_p10 }
 0x2a6   : > { %1442 = shalt.err (!%p1439_p9)
}
 0x2a7   : > { %1174 = dma.vmem_to_hbm [thread:$0]  (%p2036_p8), %s1823_s12, 128, %s1834_s18, %s1836_s28, %s2037_s16, %s2037_s16, %s1573_s19   ;;  %v1156_v35 = vpack.c.bf16 %v705_v34, %v704_v33 }
 0x2a8   : > { %s2038_s7 = sld [smem:[#allocation24_spill]]  ;;  %s2039_s27 = scalar_lea.vmem [#allocation8], %s1783_s22 }
 0x2a9   : > { %1157 = vst [vmem:[%s2039_s27] sm:$0xff] %v1156_v35   ;;  %s783_s25 = scalar_lea.sflag [#allocation4], %s1766_s10  ;;  %s1443_s2 = scalar_lea.vmem %s1894_s26, 128 }
 0x2aa   : > { %p1444_p12 = scmp.ne.s32.totalorder %s1894_s26, %s1443_s2  ;;  %s1575_s12 = smov [#allocation8]  }
 0x2ab   : > { %s1447_s18 = sshll.u32 %s1575_s12, 4  ;;  %s1448_s18 = int_to_ptr.vmem [resolvable:$false] %s1447_s18 }
 0x2ac   : > { %p1445_p13 = pnand %p1444_p12, %p2036_p8  ;;  %s1449_s28 = scalar_lea.vmem %s1448_s18, 256 }
 0x2ad   : > { %p1450_p2 = scmp.lt.s32.totalorder %s1894_s26, %s1448_s18  ;;  %p1451_p6 = scmp.lt.s32.totalorder %s1449_s28, %s1443_s2 }
 0x2ae   : > { %s1891_s13 = scalar_lea.hbm %s2038_s7, %s1808_s20  ;;  %p1446_p4 = pneg %p1445_p13 }
 0x2af   : > { %p1452_p11 = por %p1451_p6, %p1450_p2 }
 0x2b1   : > { %p1453_p1 = pnand %p1452_p11, %p1446_p4 }
 0x2b3   : > { %1456 = shalt.err (!%p1453_p1)
}
 0x2b4   : > { %s1457_s21 = scalar_lea.hbm %s1891_s13, 128  ;;  %s1461_s9 = scalar_lea.hbm %s2038_s7, 256 }
 0x2b5   : > { %p1458_p0 = scmp.ne.s32.totalorder %s1891_s13, %s1457_s21  ;;  %p1462_p3 = scmp.lt.s32.totalorder %s1891_s13, %s2038_s7 }
 0x2b6   : > { %p1463_p7 = scmp.lt.s32.totalorder %s1461_s9, %s1457_s21 }
 0x2b7   : > { %p1459_p10 = pnand %p1458_p0, %p2036_p8 }
 0x2b8   : > { %p1464_p9 = por %p1463_p7, %p1462_p3 }
 0x2b9   : > { %p1460_p5 = pneg %p1459_p10 }
 0x2bb   : > { %p1465_p12 = pnand %p1464_p9, %p1460_p5 }
 0x2bd   : > { %1468 = shalt.err (!%p1465_p12)
}
 0x2be   : > { %1172 = dma.vmem_to_hbm [thread:$0]  (%p2036_p8), %s1894_s26, 128, %s1891_s13, %s783_s25, %s2037_s16, %s2037_s16, %s1573_s19  }
 0x2bf   : > { %s456_s2 = scalar_lea.vmem [#allocation12], %s1783_s22  ;;  %s2040_s30 = sld [smem:[#allocation27_spill]] }
 0x2c0   : > { %s867_s18 = sshll.u32 %s456_s2, 4  ;;  %s798_s9 = scalar_lea.sflag [#allocation13], %s1766_s10  ;;  %s1924_s18 = int_to_ptr.vmem [resolvable:$true] %s867_s18 }
 0x2c1   : > { %s1469_s26 = scalar_lea.vmem %s1924_s18, 128  ;;  %s1576_s22 = smov [#allocation12]  }
 0x2c2   : > { %p1470_p13 = scmp.ne.s32.totalorder %s1924_s18, %s1469_s26  ;;  %s1473_s13 = sshll.u32 %s1576_s22, 4  ;;  %s1474_s13 = int_to_ptr.vmem [resolvable:$false] %s1473_s13 }
 0x2c3   : > { %s1475_s25 = scalar_lea.vmem %s1474_s13, 256  ;;  %p1476_p6 = scmp.lt.s32.totalorder %s1924_s18, %s1474_s13 }
 0x2c4   : > { %p1471_p4 = pnand %p1470_p13, %p2036_p8  ;;  %p1477_p11 = scmp.lt.s32.totalorder %s1475_s25, %s1469_s26 }
 0x2c5   : > { %s1930_s0 = scalar_lea.hbm %s2040_s30, %s1808_s20 }
 0x2c6   : > { %p1472_p2 = pneg %p1471_p4  ;;  %p1478_p1 = por %p1477_p11, %p1476_p6 }
 0x2c8   : > { %p1479_p0 = pnand %p1478_p1, %p1472_p2 }
 0x2ef   : > { %v775_v36 = vpop.permute.xlu0 %774 }
 0x2f0   : > { %780 = vst.msk [vmem:[%s456_s2] sm:$0xf] %vm765_vm1, %v775_v36 }
 0x305   : > { %v777_v37 = vpop.permute.xlu1 %776 }
 0x306   : > { %781 = vst.msk [vmem:[%s456_s2 + $0x4] sm:$0xf] %vm765_vm1, %v777_v37 }
 0x307   : > { %1482 = shalt.err (!%p1479_p0)
}
 0x308   : > { %s1483_s20 = scalar_lea.hbm %s1930_s0, 128  ;;  %s1487_s12 = scalar_lea.hbm %s2040_s30, 256 }
 0x309   : > { %p1484_p10 = scmp.ne.s32.totalorder %s1930_s0, %s1483_s20  ;;  %p1488_p7 = scmp.lt.s32.totalorder %s1930_s0, %s2040_s30 }
 0x30a   : > { %p1489_p9 = scmp.lt.s32.totalorder %s1487_s12, %s1483_s20 }
 0x30b   : > { %p1485_p5 = pnand %p1484_p10, %p2036_p8 }
 0x30c   : > { %p1490_p12 = por %p1489_p9, %p1488_p7 }
 0x30d   : > { %p1486_p3 = pneg %p1485_p5 }
 0x30f   : > { %p1491_p13 = pnand %p1490_p12, %p1486_p3 }
 0x311   : > { %1494 = shalt.err (!%p1491_p13)
}
 0x312   : > { %1175 = dma.vmem_to_hbm [thread:$0]  (%p2036_p8), %s1924_s18, 128, %s1930_s0, %s798_s9, %s2037_s16, %s2037_s16, %s1573_s19  }
 0x313 PF: > { %s2041_s21 = sld [smem:[#allocation19_spill]] }
 0x314   : > { %s2042_s26 = sld [smem:[#allocation21_spill]] }
 0x315   : > { %s2043_s22 = sld [smem:[#allocation20_spill]] }
 0x319   : > { %s882_s13 = sand.u32 1, %s2041_s21  }
 0x31a   : > { %p2044_p4 = scmp.ne.s32.totalorder %s2042_s26, 0  ;;  %s883_s25 = scalar_lea.sflag [#allocation4], %s882_s13 }
 0x31b   : > { %p2045_p2 = scmp.ge.s32.totalorder %s2043_s22, 2 }
 0x31d   : > { %p1192_p6 = pnand %p2045_p2, %p2044_p4 }
 0x31f   : > { %p1193_p11 = pneg %p1192_p6 }
 0x321   : > { %1528 = dma.done.wait (%p1193_p11), %s883_s25, 128  }
 0x322   : > { %1530 = vsyncadd (%p1193_p11), %s883_s25, 4294967168  ;;  %s2046_s23 = sadd.s32 4294967294, %s2043_s22  }
 0x323   : > { %s891_s20 = sand.u32 1, %s2046_s23  }
 0x324   : > { %s892_s10 = scalar_lea.sflag [#allocation10], %s891_s20 }
 0x325   : > { %1532 = dma.done.wait (%p1193_p11), %s892_s10, 256  }
 0x326   : > { %1534 = vsyncadd (%p1193_p11), %s892_s10, 4294967040  ;;  %s910_s27 = scalar_lea.sflag [#allocation13], %s882_s13 }
 0x327   : > { %1536 = dma.done.wait (%p1193_p11), %s910_s27, 128  }
 0x328   : > { %1538 = vsyncadd (%p1193_p11), %s910_s27, 4294967168  ;;  %s34_s18 = sadd.s32 1, %s2043_s22   ;;  %s2047_s13 = smov %s1545_s14 }
 0x329   : > { %p31_p8 = scmp.ge.s32.totalorder %s34_s18, 4   ;;  %s2048_s14 = smov %s1549_s15 }
 0x32a   : > { %s2049_s15 = smov %s1761_s8  ;;  %s2050_s16 = smov %s1557_s17 }
 0x32b   : > { %s2051_s17 = smov %s2053_s29  ;;  %33 = sbr.rel (!%p31_p8) target bundleno = 18 (0x12), region = 150 }
 0x330   :  { %915 = vsyncpa [#allocation3], 1 }
 0x331   :  { %917 = vsyncpa [#allocation3 + $0x1], 1 }
 0x332   :  { %918 = vsyncpa [#allocation6], 1 }
 0x333   :  { %919 = vsyncpa [#allocation4], 1 }
 0x334   :  { %921 = vsyncpa [#allocation4 + $0x1], 1 }
 0x335   :  { %922 = vsyncpa [#allocation10], 1 }
 0x336   :  { %924 = vsyncpa [#allocation10 + $0x1], 1 }
 0x337   :  { %925 = vsyncpa [#allocation13], 1 }
 0x338   :  { %927 = vsyncpa [#allocation13 + $0x1], 1 }

</bundles_post_ra>
